<compile_context>
chip_gen: v5e
topology: v5e:2x2
jax: 0.10.0
libtpu: 0.0.40
codegen_flags: <defaults>
</compile_context>

<pallas_src>
import numpy as np
import jax
import jax.numpy as jnp
from jax.experimental import pallas as pl
from jax.experimental.pallas import tpu as pltpu


def make_kernel(S, B, D, H, O):
    def kernel(x2d_ref, wih_ref, whh_ref, bsum_ref,
               wah_ref, bab_ref, wao_ref, we_ref,
               wout_ref, bout_ref,
               be_ref, labels_ref,
               logits_ref, loss_ref,
               out_scr):
        f32 = jnp.float32

        # ---- Hoisted input projection: one batched matmul ----
        whh = whh_ref[...]                                    # (H, 4H)
        xw = (jnp.dot(x2d_ref[...], wih_ref[...],
                      preferred_element_type=f32)
              + bsum_ref[...])                                # (S*B, 4H), t-major rows

        # ---- LSTM recurrence: h/c in registers, fully unrolled ----
        h = jnp.zeros((B, H), f32)
        c = jnp.zeros((B, H), f32)
        outs = []
        for t in range(S):
            gates = xw[t * B:(t + 1) * B, :] + jnp.dot(
                h, whh, preferred_element_type=f32)           # (B, 4H), PyTorch order i,f,g,o
            # NOTE: with H=32 each gate slice is a 32-lane sub-vector of a
            # 128-lane vreg; keep H a multiple of 128 if this kernel is scaled.
            i_g = jax.nn.sigmoid(gates[:, 0 * H:1 * H])
            f_g = jax.nn.sigmoid(gates[:, 1 * H:2 * H])
            g_g = jnp.tanh(gates[:, 2 * H:3 * H])
            o_g = jax.nn.sigmoid(gates[:, 3 * H:4 * H])
            c = f_g * c + i_g * g_g
            h = o_g * jnp.tanh(c)
            outs.append(h)
            out_scr[t * B:(t + 1) * B, :] = h                 # off the serial chain

        final_h = h                                           # == hidden[-1]

        # ---- Bahdanau attention (energies in one batched matmul) ----
        bias_b = (jnp.dot(final_h, wao_ref[...],
                          preferred_element_type=f32)
                  + bab_ref[...])                             # (B, H), bias pre-summed
        em = jnp.dot(out_scr[...], wah_ref[...],
                     preferred_element_type=f32)              # (S*B, H)
        we_row = we_ref[...]                                  # (1, H)
        be = be_ref[0]                                        # scalar from SMEM

        lane_iota = jax.lax.broadcasted_iota(jnp.int32, (B, S), 1)
        scores = jnp.zeros((B, S), f32)                       # S on lane axis
        for t in range(S):
            e_t = jnp.tanh(em[t * B:(t + 1) * B, :] + bias_b) # (B, H)
            s_t = jnp.sum(e_t * we_row, axis=1, keepdims=True)  # (B, 1)
            scores = jnp.where(lane_iota == t, s_t, scores)
        scores = scores + be

        m = jnp.max(scores, axis=1, keepdims=True)            # lane reduce
        p = jnp.exp(scores - m)
        attn = p / jnp.sum(p, axis=1, keepdims=True)          # (B, S)

        context = jnp.zeros((B, H), f32)
        for t in range(S):
            context = context + attn[:, t:t + 1] * outs[t]    # (B, H)

        # ---- output head (dropout = identity in eval mode) ----
        logits = (jnp.dot(context, wout_ref[...],
                          preferred_element_type=f32) + bout_ref[...])  # (B, O)
        logits_ref[...] = logits

        # ---- mean cross-entropy loss ----
        lmax = jnp.max(logits, axis=1, keepdims=True)
        lse = lmax + jnp.log(jnp.sum(jnp.exp(logits - lmax), axis=1, keepdims=True))
        cls_idx = jax.lax.broadcasted_iota(jnp.int32, (B, O), 1)
        onehot = (cls_idx == labels_ref[...]).astype(f32)     # (B, O) via broadcast
        picked = jnp.sum(logits * onehot, axis=1, keepdims=True)   # (B, 1)
        total = jnp.sum(lse - picked, axis=0, keepdims=True)       # (1, 1)
        loss_ref[...] = total * (1.0 / B)

    return kernel


def run_model(x_tokens, labels, params, *, d_model, hidden_dim, output_dim):
    B, S = x_tokens.shape
    D, H, O = d_model, hidden_dim, output_dim

    # Glue: embedding gather + time-major flatten to (S*B, D).
    emb = params['emb'][x_tokens]                                   # (B, S, D)
    x2d = jnp.transpose(emb, (1, 0, 2)).reshape(S * B, D).astype(jnp.float32)

    # Host-side bias pre-sums (hoisted out of the kernel).
    bsum = (params['b_ih'] + params['b_hh'])[None, :]               # (1, 4H)
    bab = (params['b_ao'] + params['b_ah'])[None, :]                # (1, H)

    kernel = make_kernel(S, B, D, H, O)
    vmem = pl.BlockSpec(memory_space=pltpu.MemorySpace.VMEM)
    smem = pl.BlockSpec(memory_space=pltpu.MemorySpace.SMEM)

    logits, loss = pl.pallas_call(
        kernel,
        out_shape=(jax.ShapeDtypeStruct((B, O), jnp.float32),
                   jax.ShapeDtypeStruct((1, 1), jnp.float32)),
        in_specs=[vmem] * 10 + [smem, vmem],
        out_specs=(vmem, vmem),
        scratch_shapes=[
            pltpu.VMEM((S * B, H), jnp.float32),   # LSTM output sequence (t-major rows)
        ],
    )(
        x2d,
        params['w_ih'].T, params['w_hh'].T,                     # (D,4H), (H,4H)
        bsum,                                                   # (1,4H)
        params['w_ah'].T, bab,                                  # (H,H), (1,H)
        params['w_ao'].T,                                       # (H,H)
        params['w_e'],                                          # (1,H)
        params['w_out'].T, params['b_out'][None, :],            # (H,O), (1,O)
        params['b_e'],                                          # (1,)  -> SMEM
        labels.astype(jnp.int32).reshape(B, 1),                 # (B,1) -> VMEM
    )
    return logits, loss[0, 0]


def init_params(key, vocab_size, d_model, hidden_dim, output_dim):
    ks = jax.random.split(key, 13)
    u = lambda k, shape, s=0.1: jax.random.uniform(k, shape, jnp.float32, -s, s)
    emb = u(ks[0], (vocab_size, d_model))
    emb = emb.at[0].set(0.0)   # padding_idx = 0
    return dict(
        emb=emb,
        w_ih=u(ks[1], (4 * hidden_dim, d_model)),
        w_hh=u(ks[2], (4 * hidden_dim, hidden_dim)),
        b_ih=u(ks[3], (4 * hidden_dim,)),
        b_hh=u(ks[4], (4 * hidden_dim,)),
        w_ah=u(ks[5], (hidden_dim, hidden_dim)),
        b_ah=u(ks[6], (hidden_dim,)),
        w_ao=u(ks[7], (hidden_dim, hidden_dim)),
        b_ao=u(ks[8], (hidden_dim,)),
        w_e=u(ks[9], (1, hidden_dim)),
        b_e=u(ks[10], (1,)),
        w_out=u(ks[11], (output_dim, hidden_dim)),
        b_out=u(ks[12], (output_dim,)),
    )


def reference(x_tokens, labels, params):
    """Pure-JAX reference matching the PyTorch module (eval mode)."""
    emb = params['emb'][x_tokens]
    B, S, _ = emb.shape
    H = params['w_hh'].shape[1]
    h = jnp.zeros((B, H), jnp.float32)
    c = jnp.zeros((B, H), jnp.float32)
    outs = []
    for t in range(S):
        gates = (emb[:, t] @ params['w_ih'].T + params['b_ih']
                 + h @ params['w_hh'].T + params['b_hh'])
        i, f, g, o = jnp.split(gates, 4, axis=1)
        i, f, o = jax.nn.sigmoid(i), jax.nn.sigmoid(f), jax.nn.sigmoid(o)
        g = jnp.tanh(g)
        c = f * c + i * g
        h = o * jnp.tanh(c)
        outs.append(h)
    output = jnp.stack(outs, axis=1)                              # (B, S, H)
    final = h
    energy = jnp.tanh(output @ params['w_ah'].T + params['b_ah']
                      + (final @ params['w_ao'].T + params['b_ao'])[:, None, :])
    energy = (energy @ params['w_e'].T)[..., 0] + params['b_e'][0]   # (B, S)
    attn = jax.nn.softmax(energy, axis=1)
    context = jnp.einsum('bs,bsh->bh', attn, output)
    logits = context @ params['w_out'].T + params['b_out']
    lse = jax.scipy.special.logsumexp(logits, axis=1)
    picked = jnp.take_along_axis(logits, labels[:, None], axis=1)[:, 0]
    loss = jnp.mean(lse - picked)
    return logits, loss


if __name__ == "__main__":
    B, S = 2, 8
    vocab_size, d_model, hidden_dim, output_dim = 50, 16, 32, 5
    layer_dim = 1
    # TODO(synk): stacked LSTM (layer_dim > 1, with inter-layer dropout) not
    # implemented in the kernel; this script uses layer_dim = 1.

    key = jax.random.PRNGKey(0)
    kp, kx, kl = jax.random.split(key, 3)
    params = init_params(kp, vocab_size, d_model, hidden_dim, output_dim)
    x = jax.random.randint(kx, (B, S), 0, vocab_size, dtype=jnp.int32)
    labels = jax.random.randint(kl, (B,), 0, output_dim, dtype=jnp.int32)

    logits, loss = run_model(x, labels, params,
                             d_model=d_model, hidden_dim=hidden_dim,
                             output_dim=output_dim)
    jax.block_until_ready((logits, loss))

    ref_logits, ref_loss = reference(x, labels, params)
    assert np.allclose(np.asarray(logits), np.asarray(ref_logits), atol=1e-3), \
        "logits mismatch vs reference"
    assert np.allclose(float(loss), float(ref_loss), atol=1e-3), \
        "loss mismatch vs reference"
    print("KERNEL_OK")
</pallas_src>

<mosaic_0001>
module attributes {stable_mosaic.version = 11 : i64} {
  func.func @kernel(%arg0: memref<16x16xf32, #tpu.memory_space<vmem>>, %arg1: memref<16x128xf32, #tpu.memory_space<vmem>>, %arg2: memref<32x128xf32, #tpu.memory_space<vmem>>, %arg3: memref<1x128xf32, #tpu.memory_space<vmem>>, %arg4: memref<32x32xf32, #tpu.memory_space<vmem>>, %arg5: memref<1x32xf32, #tpu.memory_space<vmem>>, %arg6: memref<32x32xf32, #tpu.memory_space<vmem>>, %arg7: memref<1x32xf32, #tpu.memory_space<vmem>>, %arg8: memref<32x5xf32, #tpu.memory_space<vmem>>, %arg9: memref<1x5xf32, #tpu.memory_space<vmem>>, %arg10: memref<1xf32, #tpu.memory_space<smem>>, %arg11: memref<2x1xi32, #tpu.memory_space<vmem>>, %arg12: memref<2x5xf32, #tpu.memory_space<vmem>>, %arg13: memref<1x1xf32, #tpu.memory_space<vmem>>, %arg14: memref<16x32xf32, #tpu.memory_space<vmem>>) attributes {dimension_semantics = [], scalar_prefetch = 0 : i64, scratch_operands = 1 : i64, tpu.core_type = #tpu.core_type<tc>} {
    %c0 = arith.constant 0 : index
    %c0_0 = arith.constant 0 : index
    %0 = vector.load %arg2[%c0, %c0_0] : memref<32x128xf32, #tpu.memory_space<vmem>>, vector<32x128xf32>
    %c0_1 = arith.constant 0 : index
    %c0_2 = arith.constant 0 : index
    %1 = vector.load %arg0[%c0_1, %c0_2] : memref<16x16xf32, #tpu.memory_space<vmem>>, vector<16x16xf32>
    %c0_3 = arith.constant 0 : index
    %c0_4 = arith.constant 0 : index
    %2 = vector.load %arg1[%c0_3, %c0_4] : memref<16x128xf32, #tpu.memory_space<vmem>>, vector<16x128xf32>
    %cst = arith.constant dense<0.000000e+00> : vector<16x128xf32>
    %3 = tpu.matmul %1, %2, %cst {dimension_numbers = #tpu.dot_dimension_numbers<[1], [0], [0], [1], [0, 0, 1, 1], [], []>} : vector<16x16xf32>, vector<16x128xf32>, vector<16x128xf32> -> vector<16x128xf32>
    %c0_5 = arith.constant 0 : index
    %c0_6 = arith.constant 0 : index
    %4 = vector.load %arg3[%c0_5, %c0_6] : memref<1x128xf32, #tpu.memory_space<vmem>>, vector<1x128xf32>
    %5 = vector.broadcast %4 : vector<1x128xf32> to vector<16x128xf32>
    %6 = arith.addf %3, %5 : vector<16x128xf32>
    %cst_7 = arith.constant 0.000000e+00 : f32
    %7 = vector.broadcast %cst_7 : f32 to vector<2x32xf32>
    %cst_8 = arith.constant 0.000000e+00 : f32
    %8 = vector.broadcast %cst_8 : f32 to vector<2x32xf32>
    %9 = vector.extract_strided_slice %6 {offsets = [0, 0], sizes = [2, 128], strides = [1, 1]} : vector<16x128xf32> to vector<2x128xf32>
    %cst_9 = arith.constant dense<0.000000e+00> : vector<2x128xf32>
    %10 = tpu.matmul %7, %0, %cst_9 {dimension_numbers = #tpu.dot_dimension_numbers<[1], [0], [0], [1], [0, 0, 1, 1], [], []>} : vector<2x32xf32>, vector<32x128xf32>, vector<2x128xf32> -> vector<2x128xf32>
    %11 = arith.addf %9, %10 : vector<2x128xf32>
    %12 = vector.extract_strided_slice %11 {offsets = [0, 0], sizes = [2, 32], strides = [1, 1]} : vector<2x128xf32> to vector<2x32xf32>
    %13 = arith.negf %12 : vector<2x32xf32>
    %14 = math.exp %13 : vector<2x32xf32>
    %cst_10 = arith.constant 1.000000e+00 : f32
    %15 = vector.broadcast %cst_10 : f32 to vector<2x32xf32>
    %16 = arith.addf %15, %14 : vector<2x32xf32>
    %17 = arith.divf %15, %16 : vector<2x32xf32>
    %18 = vector.extract_strided_slice %11 {offsets = [0, 32], sizes = [2, 32], strides = [1, 1]} : vector<2x128xf32> to vector<2x32xf32>
    %19 = arith.negf %18 : vector<2x32xf32>
    %20 = math.exp %19 : vector<2x32xf32>
    %cst_11 = arith.constant 1.000000e+00 : f32
    %21 = vector.broadcast %cst_11 : f32 to vector<2x32xf32>
    %22 = arith.addf %21, %20 : vector<2x32xf32>
    %23 = arith.divf %21, %22 : vector<2x32xf32>
    %24 = vector.extract_strided_slice %11 {offsets = [0, 64], sizes = [2, 32], strides = [1, 1]} : vector<2x128xf32> to vector<2x32xf32>
    %25 = math.tanh %24 : vector<2x32xf32>
    %26 = vector.extract_strided_slice %11 {offsets = [0, 96], sizes = [2, 32], strides = [1, 1]} : vector<2x128xf32> to vector<2x32xf32>
    %27 = arith.negf %26 : vector<2x32xf32>
    %28 = math.exp %27 : vector<2x32xf32>
    %cst_12 = arith.constant 1.000000e+00 : f32
    %29 = vector.broadcast %cst_12 : f32 to vector<2x32xf32>
    %30 = arith.addf %29, %28 : vector<2x32xf32>
    %31 = arith.divf %29, %30 : vector<2x32xf32>
    %32 = arith.mulf %23, %8 : vector<2x32xf32>
    %33 = arith.mulf %17, %25 : vector<2x32xf32>
    %34 = arith.addf %32, %33 : vector<2x32xf32>
    %35 = math.tanh %34 : vector<2x32xf32>
    %36 = arith.mulf %31, %35 : vector<2x32xf32>
    %c0_13 = arith.constant 0 : index
    %c0_14 = arith.constant 0 : index
    %37 = vector.load %arg14[%c0_13, %c0_14] : memref<16x32xf32, #tpu.memory_space<vmem>>, vector<2x32xf32>
    tpu.vector_store %arg14[%c0_13, %c0_14], %36 {strides = array<i32>} : memref<16x32xf32, #tpu.memory_space<vmem>>, vector<2x32xf32>,
    %38 = vector.extract_strided_slice %6 {offsets = [2, 0], sizes = [2, 128], strides = [1, 1]} : vector<16x128xf32> to vector<2x128xf32>
    %cst_15 = arith.constant dense<0.000000e+00> : vector<2x128xf32>
    %39 = tpu.matmul %36, %0, %cst_15 {dimension_numbers = #tpu.dot_dimension_numbers<[1], [0], [0], [1], [0, 0, 1, 1], [], []>} : vector<2x32xf32>, vector<32x128xf32>, vector<2x128xf32> -> vector<2x128xf32>
    %40 = arith.addf %38, %39 : vector<2x128xf32>
    %41 = vector.extract_strided_slice %40 {offsets = [0, 0], sizes = [2, 32], strides = [1, 1]} : vector<2x128xf32> to vector<2x32xf32>
    %42 = arith.negf %41 : vector<2x32xf32>
    %43 = math.exp %42 : vector<2x32xf32>
    %cst_16 = arith.constant 1.000000e+00 : f32
    %44 = vector.broadcast %cst_16 : f32 to vector<2x32xf32>
    %45 = arith.addf %44, %43 : vector<2x32xf32>
    %46 = arith.divf %44, %45 : vector<2x32xf32>
    %47 = vector.extract_strided_slice %40 {offsets = [0, 32], sizes = [2, 32], strides = [1, 1]} : vector<2x128xf32> to vector<2x32xf32>
    %48 = arith.negf %47 : vector<2x32xf32>
    %49 = math.exp %48 : vector<2x32xf32>
    %cst_17 = arith.constant 1.000000e+00 : f32
    %50 = vector.broadcast %cst_17 : f32 to vector<2x32xf32>
    %51 = arith.addf %50, %49 : vector<2x32xf32>
    %52 = arith.divf %50, %51 : vector<2x32xf32>
    %53 = vector.extract_strided_slice %40 {offsets = [0, 64], sizes = [2, 32], strides = [1, 1]} : vector<2x128xf32> to vector<2x32xf32>
    %54 = math.tanh %53 : vector<2x32xf32>
    %55 = vector.extract_strided_slice %40 {offsets = [0, 96], sizes = [2, 32], strides = [1, 1]} : vector<2x128xf32> to vector<2x32xf32>
    %56 = arith.negf %55 : vector<2x32xf32>
    %57 = math.exp %56 : vector<2x32xf32>
    %cst_18 = arith.constant 1.000000e+00 : f32
    %58 = vector.broadcast %cst_18 : f32 to vector<2x32xf32>
    %59 = arith.addf %58, %57 : vector<2x32xf32>
    %60 = arith.divf %58, %59 : vector<2x32xf32>
    %61 = arith.mulf %52, %34 : vector<2x32xf32>
    %62 = arith.mulf %46, %54 : vector<2x32xf32>
    %63 = arith.addf %61, %62 : vector<2x32xf32>
    %64 = math.tanh %63 : vector<2x32xf32>
    %65 = arith.mulf %60, %64 : vector<2x32xf32>
    %c2 = arith.constant 2 : index
    %c0_19 = arith.constant 0 : index
    %66 = vector.load %arg14[%c2, %c0_19] : memref<16x32xf32, #tpu.memory_space<vmem>>, vector<2x32xf32>
    tpu.vector_store %arg14[%c2, %c0_19], %65 {strides = array<i32>} : memref<16x32xf32, #tpu.memory_space<vmem>>, vector<2x32xf32>,
    %67 = vector.extract_strided_slice %6 {offsets = [4, 0], sizes = [2, 128], strides = [1, 1]} : vector<16x128xf32> to vector<2x128xf32>
    %cst_20 = arith.constant dense<0.000000e+00> : vector<2x128xf32>
    %68 = tpu.matmul %65, %0, %cst_20 {dimension_numbers = #tpu.dot_dimension_numbers<[1], [0], [0], [1], [0, 0, 1, 1], [], []>} : vector<2x32xf32>, vector<32x128xf32>, vector<2x128xf32> -> vector<2x128xf32>
    %69 = arith.addf %67, %68 : vector<2x128xf32>
    %70 = vector.extract_strided_slice %69 {offsets = [0, 0], sizes = [2, 32], strides = [1, 1]} : vector<2x128xf32> to vector<2x32xf32>
    %71 = arith.negf %70 : vector<2x32xf32>
    %72 = math.exp %71 : vector<2x32xf32>
    %cst_21 = arith.constant 1.000000e+00 : f32
    %73 = vector.broadcast %cst_21 : f32 to vector<2x32xf32>
    %74 = arith.addf %73, %72 : vector<2x32xf32>
    %75 = arith.divf %73, %74 : vector<2x32xf32>
    %76 = vector.extract_strided_slice %69 {offsets = [0, 32], sizes = [2, 32], strides = [1, 1]} : vector<2x128xf32> to vector<2x32xf32>
    %77 = arith.negf %76 : vector<2x32xf32>
    %78 = math.exp %77 : vector<2x32xf32>
    %cst_22 = arith.constant 1.000000e+00 : f32
    %79 = vector.broadcast %cst_22 : f32 to vector<2x32xf32>
    %80 = arith.addf %79, %78 : vector<2x32xf32>
    %81 = arith.divf %79, %80 : vector<2x32xf32>
    %82 = vector.extract_strided_slice %69 {offsets = [0, 64], sizes = [2, 32], strides = [1, 1]} : vector<2x128xf32> to vector<2x32xf32>
    %83 = math.tanh %82 : vector<2x32xf32>
    %84 = vector.extract_strided_slice %69 {offsets = [0, 96], sizes = [2, 32], strides = [1, 1]} : vector<2x128xf32> to vector<2x32xf32>
    %85 = arith.negf %84 : vector<2x32xf32>
    %86 = math.exp %85 : vector<2x32xf32>
    %cst_23 = arith.constant 1.000000e+00 : f32
    %87 = vector.broadcast %cst_23 : f32 to vector<2x32xf32>
    %88 = arith.addf %87, %86 : vector<2x32xf32>
    %89 = arith.divf %87, %88 : vector<2x32xf32>
    %90 = arith.mulf %81, %63 : vector<2x32xf32>
    %91 = arith.mulf %75, %83 : vector<2x32xf32>
    %92 = arith.addf %90, %91 : vector<2x32xf32>
    %93 = math.tanh %92 : vector<2x32xf32>
    %94 = arith.mulf %89, %93 : vector<2x32xf32>
    %c4 = arith.constant 4 : index
    %c0_24 = arith.constant 0 : index
    %95 = vector.load %arg14[%c4, %c0_24] : memref<16x32xf32, #tpu.memory_space<vmem>>, vector<2x32xf32>
    tpu.vector_store %arg14[%c4, %c0_24], %94 {strides = array<i32>} : memref<16x32xf32, #tpu.memory_space<vmem>>, vector<2x32xf32>,
    %96 = vector.extract_strided_slice %6 {offsets = [6, 0], sizes = [2, 128], strides = [1, 1]} : vector<16x128xf32> to vector<2x128xf32>
    %cst_25 = arith.constant dense<0.000000e+00> : vector<2x128xf32>
    %97 = tpu.matmul %94, %0, %cst_25 {dimension_numbers = #tpu.dot_dimension_numbers<[1], [0], [0], [1], [0, 0, 1, 1], [], []>} : vector<2x32xf32>, vector<32x128xf32>, vector<2x128xf32> -> vector<2x128xf32>
    %98 = arith.addf %96, %97 : vector<2x128xf32>
    %99 = vector.extract_strided_slice %98 {offsets = [0, 0], sizes = [2, 32], strides = [1, 1]} : vector<2x128xf32> to vector<2x32xf32>
    %100 = arith.negf %99 : vector<2x32xf32>
    %101 = math.exp %100 : vector<2x32xf32>
    %cst_26 = arith.constant 1.000000e+00 : f32
    %102 = vector.broadcast %cst_26 : f32 to vector<2x32xf32>
    %103 = arith.addf %102, %101 : vector<2x32xf32>
    %104 = arith.divf %102, %103 : vector<2x32xf32>
    %105 = vector.extract_strided_slice %98 {offsets = [0, 32], sizes = [2, 32], strides = [1, 1]} : vector<2x128xf32> to vector<2x32xf32>
    %106 = arith.negf %105 : vector<2x32xf32>
    %107 = math.exp %106 : vector<2x32xf32>
    %cst_27 = arith.constant 1.000000e+00 : f32
    %108 = vector.broadcast %cst_27 : f32 to vector<2x32xf32>
    %109 = arith.addf %108, %107 : vector<2x32xf32>
    %110 = arith.divf %108, %109 : vector<2x32xf32>
    %111 = vector.extract_strided_slice %98 {offsets = [0, 64], sizes = [2, 32], strides = [1, 1]} : vector<2x128xf32> to vector<2x32xf32>
    %112 = math.tanh %111 : vector<2x32xf32>
    %113 = vector.extract_strided_slice %98 {offsets = [0, 96], sizes = [2, 32], strides = [1, 1]} : vector<2x128xf32> to vector<2x32xf32>
    %114 = arith.negf %113 : vector<2x32xf32>
    %115 = math.exp %114 : vector<2x32xf32>
    %cst_28 = arith.constant 1.000000e+00 : f32
    %116 = vector.broadcast %cst_28 : f32 to vector<2x32xf32>
    %117 = arith.addf %116, %115 : vector<2x32xf32>
    %118 = arith.divf %116, %117 : vector<2x32xf32>
    %119 = arith.mulf %110, %92 : vector<2x32xf32>
    %120 = arith.mulf %104, %112 : vector<2x32xf32>
    %121 = arith.addf %119, %120 : vector<2x32xf32>
    %122 = math.tanh %121 : vector<2x32xf32>
    %123 = arith.mulf %118, %122 : vector<2x32xf32>
    %c6 = arith.constant 6 : index
    %c0_29 = arith.constant 0 : index
    %124 = vector.load %arg14[%c6, %c0_29] : memref<16x32xf32, #tpu.memory_space<vmem>>, vector<2x32xf32>
    tpu.vector_store %arg14[%c6, %c0_29], %123 {strides = array<i32>} : memref<16x32xf32, #tpu.memory_space<vmem>>, vector<2x32xf32>,
    %125 = vector.extract_strided_slice %6 {offsets = [8, 0], sizes = [2, 128], strides = [1, 1]} : vector<16x128xf32> to vector<2x128xf32>
    %cst_30 = arith.constant dense<0.000000e+00> : vector<2x128xf32>
    %126 = tpu.matmul %123, %0, %cst_30 {dimension_numbers = #tpu.dot_dimension_numbers<[1], [0], [0], [1], [0, 0, 1, 1], [], []>} : vector<2x32xf32>, vector<32x128xf32>, vector<2x128xf32> -> vector<2x128xf32>
    %127 = arith.addf %125, %126 : vector<2x128xf32>
    %128 = vector.extract_strided_slice %127 {offsets = [0, 0], sizes = [2, 32], strides = [1, 1]} : vector<2x128xf32> to vector<2x32xf32>
    %129 = arith.negf %128 : vector<2x32xf32>
    %130 = math.exp %129 : vector<2x32xf32>
    %cst_31 = arith.constant 1.000000e+00 : f32
    %131 = vector.broadcast %cst_31 : f32 to vector<2x32xf32>
    %132 = arith.addf %131, %130 : vector<2x32xf32>
    %133 = arith.divf %131, %132 : vector<2x32xf32>
    %134 = vector.extract_strided_slice %127 {offsets = [0, 32], sizes = [2, 32], strides = [1, 1]} : vector<2x128xf32> to vector<2x32xf32>
    %135 = arith.negf %134 : vector<2x32xf32>
    %136 = math.exp %135 : vector<2x32xf32>
    %cst_32 = arith.constant 1.000000e+00 : f32
    %137 = vector.broadcast %cst_32 : f32 to vector<2x32xf32>
    %138 = arith.addf %137, %136 : vector<2x32xf32>
    %139 = arith.divf %137, %138 : vector<2x32xf32>
    %140 = vector.extract_strided_slice %127 {offsets = [0, 64], sizes = [2, 32], strides = [1, 1]} : vector<2x128xf32> to vector<2x32xf32>
    %141 = math.tanh %140 : vector<2x32xf32>
    %142 = vector.extract_strided_slice %127 {offsets = [0, 96], sizes = [2, 32], strides = [1, 1]} : vector<2x128xf32> to vector<2x32xf32>
    %143 = arith.negf %142 : vector<2x32xf32>
    %144 = math.exp %143 : vector<2x32xf32>
    %cst_33 = arith.constant 1.000000e+00 : f32
    %145 = vector.broadcast %cst_33 : f32 to vector<2x32xf32>
    %146 = arith.addf %145, %144 : vector<2x32xf32>
    %147 = arith.divf %145, %146 : vector<2x32xf32>
    %148 = arith.mulf %139, %121 : vector<2x32xf32>
    %149 = arith.mulf %133, %141 : vector<2x32xf32>
    %150 = arith.addf %148, %149 : vector<2x32xf32>
    %151 = math.tanh %150 : vector<2x32xf32>
    %152 = arith.mulf %147, %151 : vector<2x32xf32>
    %c8 = arith.constant 8 : index
    %c0_34 = arith.constant 0 : index
    %153 = vector.load %arg14[%c8, %c0_34] : memref<16x32xf32, #tpu.memory_space<vmem>>, vector<2x32xf32>
    tpu.vector_store %arg14[%c8, %c0_34], %152 {strides = array<i32>} : memref<16x32xf32, #tpu.memory_space<vmem>>, vector<2x32xf32>,
    %154 = vector.extract_strided_slice %6 {offsets = [10, 0], sizes = [2, 128], strides = [1, 1]} : vector<16x128xf32> to vector<2x128xf32>
    %cst_35 = arith.constant dense<0.000000e+00> : vector<2x128xf32>
    %155 = tpu.matmul %152, %0, %cst_35 {dimension_numbers = #tpu.dot_dimension_numbers<[1], [0], [0], [1], [0, 0, 1, 1], [], []>} : vector<2x32xf32>, vector<32x128xf32>, vector<2x128xf32> -> vector<2x128xf32>
    %156 = arith.addf %154, %155 : vector<2x128xf32>
    %157 = vector.extract_strided_slice %156 {offsets = [0, 0], sizes = [2, 32], strides = [1, 1]} : vector<2x128xf32> to vector<2x32xf32>
    %158 = arith.negf %157 : vector<2x32xf32>
    %159 = math.exp %158 : vector<2x32xf32>
    %cst_36 = arith.constant 1.000000e+00 : f32
    %160 = vector.broadcast %cst_36 : f32 to vector<2x32xf32>
    %161 = arith.addf %160, %159 : vector<2x32xf32>
    %162 = arith.divf %160, %161 : vector<2x32xf32>
    %163 = vector.extract_strided_slice %156 {offsets = [0, 32], sizes = [2, 32], strides = [1, 1]} : vector<2x128xf32> to vector<2x32xf32>
    %164 = arith.negf %163 : vector<2x32xf32>
    %165 = math.exp %164 : vector<2x32xf32>
    %cst_37 = arith.constant 1.000000e+00 : f32
    %166 = vector.broadcast %cst_37 : f32 to vector<2x32xf32>
    %167 = arith.addf %166, %165 : vector<2x32xf32>
    %168 = arith.divf %166, %167 : vector<2x32xf32>
    %169 = vector.extract_strided_slice %156 {offsets = [0, 64], sizes = [2, 32], strides = [1, 1]} : vector<2x128xf32> to vector<2x32xf32>
    %170 = math.tanh %169 : vector<2x32xf32>
    %171 = vector.extract_strided_slice %156 {offsets = [0, 96], sizes = [2, 32], strides = [1, 1]} : vector<2x128xf32> to vector<2x32xf32>
    %172 = arith.negf %171 : vector<2x32xf32>
    %173 = math.exp %172 : vector<2x32xf32>
    %cst_38 = arith.constant 1.000000e+00 : f32
    %174 = vector.broadcast %cst_38 : f32 to vector<2x32xf32>
    %175 = arith.addf %174, %173 : vector<2x32xf32>
    %176 = arith.divf %174, %175 : vector<2x32xf32>
    %177 = arith.mulf %168, %150 : vector<2x32xf32>
    %178 = arith.mulf %162, %170 : vector<2x32xf32>
    %179 = arith.addf %177, %178 : vector<2x32xf32>
    %180 = math.tanh %179 : vector<2x32xf32>
    %181 = arith.mulf %176, %180 : vector<2x32xf32>
    %c10 = arith.constant 10 : index
    %c0_39 = arith.constant 0 : index
    %182 = vector.load %arg14[%c10, %c0_39] : memref<16x32xf32, #tpu.memory_space<vmem>>, vector<2x32xf32>
    tpu.vector_store %arg14[%c10, %c0_39], %181 {strides = array<i32>} : memref<16x32xf32, #tpu.memory_space<vmem>>, vector<2x32xf32>,
    %183 = vector.extract_strided_slice %6 {offsets = [12, 0], sizes = [2, 128], strides = [1, 1]} : vector<16x128xf32> to vector<2x128xf32>
    %cst_40 = arith.constant dense<0.000000e+00> : vector<2x128xf32>
    %184 = tpu.matmul %181, %0, %cst_40 {dimension_numbers = #tpu.dot_dimension_numbers<[1], [0], [0], [1], [0, 0, 1, 1], [], []>} : vector<2x32xf32>, vector<32x128xf32>, vector<2x128xf32> -> vector<2x128xf32>
    %185 = arith.addf %183, %184 : vector<2x128xf32>
    %186 = vector.extract_strided_slice %185 {offsets = [0, 0], sizes = [2, 32], strides = [1, 1]} : vector<2x128xf32> to vector<2x32xf32>
    %187 = arith.negf %186 : vector<2x32xf32>
    %188 = math.exp %187 : vector<2x32xf32>
    %cst_41 = arith.constant 1.000000e+00 : f32
    %189 = vector.broadcast %cst_41 : f32 to vector<2x32xf32>
    %190 = arith.addf %189, %188 : vector<2x32xf32>
    %191 = arith.divf %189, %190 : vector<2x32xf32>
    %192 = vector.extract_strided_slice %185 {offsets = [0, 32], sizes = [2, 32], strides = [1, 1]} : vector<2x128xf32> to vector<2x32xf32>
    %193 = arith.negf %192 : vector<2x32xf32>
    %194 = math.exp %193 : vector<2x32xf32>
    %cst_42 = arith.constant 1.000000e+00 : f32
    %195 = vector.broadcast %cst_42 : f32 to vector<2x32xf32>
    %196 = arith.addf %195, %194 : vector<2x32xf32>
    %197 = arith.divf %195, %196 : vector<2x32xf32>
    %198 = vector.extract_strided_slice %185 {offsets = [0, 64], sizes = [2, 32], strides = [1, 1]} : vector<2x128xf32> to vector<2x32xf32>
    %199 = math.tanh %198 : vector<2x32xf32>
    %200 = vector.extract_strided_slice %185 {offsets = [0, 96], sizes = [2, 32], strides = [1, 1]} : vector<2x128xf32> to vector<2x32xf32>
    %201 = arith.negf %200 : vector<2x32xf32>
    %202 = math.exp %201 : vector<2x32xf32>
    %cst_43 = arith.constant 1.000000e+00 : f32
    %203 = vector.broadcast %cst_43 : f32 to vector<2x32xf32>
    %204 = arith.addf %203, %202 : vector<2x32xf32>
    %205 = arith.divf %203, %204 : vector<2x32xf32>
    %206 = arith.mulf %197, %179 : vector<2x32xf32>
    %207 = arith.mulf %191, %199 : vector<2x32xf32>
    %208 = arith.addf %206, %207 : vector<2x32xf32>
    %209 = math.tanh %208 : vector<2x32xf32>
    %210 = arith.mulf %205, %209 : vector<2x32xf32>
    %c12 = arith.constant 12 : index
    %c0_44 = arith.constant 0 : index
    %211 = vector.load %arg14[%c12, %c0_44] : memref<16x32xf32, #tpu.memory_space<vmem>>, vector<2x32xf32>
    tpu.vector_store %arg14[%c12, %c0_44], %210 {strides = array<i32>} : memref<16x32xf32, #tpu.memory_space<vmem>>, vector<2x32xf32>,
    %212 = vector.extract_strided_slice %6 {offsets = [14, 0], sizes = [2, 128], strides = [1, 1]} : vector<16x128xf32> to vector<2x128xf32>
    %cst_45 = arith.constant dense<0.000000e+00> : vector<2x128xf32>
    %213 = tpu.matmul %210, %0, %cst_45 {dimension_numbers = #tpu.dot_dimension_numbers<[1], [0], [0], [1], [0, 0, 1, 1], [], []>} : vector<2x32xf32>, vector<32x128xf32>, vector<2x128xf32> -> vector<2x128xf32>
    %214 = arith.addf %212, %213 : vector<2x128xf32>
    %215 = vector.extract_strided_slice %214 {offsets = [0, 0], sizes = [2, 32], strides = [1, 1]} : vector<2x128xf32> to vector<2x32xf32>
    %216 = arith.negf %215 : vector<2x32xf32>
    %217 = math.exp %216 : vector<2x32xf32>
    %cst_46 = arith.constant 1.000000e+00 : f32
    %218 = vector.broadcast %cst_46 : f32 to vector<2x32xf32>
    %219 = arith.addf %218, %217 : vector<2x32xf32>
    %220 = arith.divf %218, %219 : vector<2x32xf32>
    %221 = vector.extract_strided_slice %214 {offsets = [0, 32], sizes = [2, 32], strides = [1, 1]} : vector<2x128xf32> to vector<2x32xf32>
    %222 = arith.negf %221 : vector<2x32xf32>
    %223 = math.exp %222 : vector<2x32xf32>
    %cst_47 = arith.constant 1.000000e+00 : f32
    %224 = vector.broadcast %cst_47 : f32 to vector<2x32xf32>
    %225 = arith.addf %224, %223 : vector<2x32xf32>
    %226 = arith.divf %224, %225 : vector<2x32xf32>
    %227 = vector.extract_strided_slice %214 {offsets = [0, 64], sizes = [2, 32], strides = [1, 1]} : vector<2x128xf32> to vector<2x32xf32>
    %228 = math.tanh %227 : vector<2x32xf32>
    %229 = vector.extract_strided_slice %214 {offsets = [0, 96], sizes = [2, 32], strides = [1, 1]} : vector<2x128xf32> to vector<2x32xf32>
    %230 = arith.negf %229 : vector<2x32xf32>
    %231 = math.exp %230 : vector<2x32xf32>
    %cst_48 = arith.constant 1.000000e+00 : f32
    %232 = vector.broadcast %cst_48 : f32 to vector<2x32xf32>
    %233 = arith.addf %232, %231 : vector<2x32xf32>
    %234 = arith.divf %232, %233 : vector<2x32xf32>
    %235 = arith.mulf %226, %208 : vector<2x32xf32>
    %236 = arith.mulf %220, %228 : vector<2x32xf32>
    %237 = arith.addf %235, %236 : vector<2x32xf32>
    %238 = math.tanh %237 : vector<2x32xf32>
    %239 = arith.mulf %234, %238 : vector<2x32xf32>
    %c14 = arith.constant 14 : index
    %c0_49 = arith.constant 0 : index
    %240 = vector.load %arg14[%c14, %c0_49] : memref<16x32xf32, #tpu.memory_space<vmem>>, vector<2x32xf32>
    tpu.vector_store %arg14[%c14, %c0_49], %239 {strides = array<i32>} : memref<16x32xf32, #tpu.memory_space<vmem>>, vector<2x32xf32>,
    %c0_50 = arith.constant 0 : index
    %c0_51 = arith.constant 0 : index
    %241 = vector.load %arg6[%c0_50, %c0_51] : memref<32x32xf32, #tpu.memory_space<vmem>>, vector<32x32xf32>
    %cst_52 = arith.constant dense<0.000000e+00> : vector<2x32xf32>
    %242 = tpu.matmul %239, %241, %cst_52 {dimension_numbers = #tpu.dot_dimension_numbers<[1], [0], [0], [1], [0, 0, 1, 1], [], []>} : vector<2x32xf32>, vector<32x32xf32>, vector<2x32xf32> -> vector<2x32xf32>
    %c0_53 = arith.constant 0 : index
    %c0_54 = arith.constant 0 : index
    %243 = vector.load %arg5[%c0_53, %c0_54] : memref<1x32xf32, #tpu.memory_space<vmem>>, vector<1x32xf32>
    %244 = vector.broadcast %243 : vector<1x32xf32> to vector<2x32xf32>
    %245 = arith.addf %242, %244 : vector<2x32xf32>
    %c0_55 = arith.constant 0 : index
    %c0_56 = arith.constant 0 : index
    %246 = vector.load %arg14[%c0_55, %c0_56] : memref<16x32xf32, #tpu.memory_space<vmem>>, vector<16x32xf32>
    %c0_57 = arith.constant 0 : index
    %c0_58 = arith.constant 0 : index
    %247 = vector.load %arg4[%c0_57, %c0_58] : memref<32x32xf32, #tpu.memory_space<vmem>>, vector<32x32xf32>
    %cst_59 = arith.constant dense<0.000000e+00> : vector<16x32xf32>
    %248 = tpu.matmul %246, %247, %cst_59 {dimension_numbers = #tpu.dot_dimension_numbers<[1], [0], [0], [1], [0, 0, 1, 1], [], []>} : vector<16x32xf32>, vector<32x32xf32>, vector<16x32xf32> -> vector<16x32xf32>
    %c0_60 = arith.constant 0 : index
    %c0_61 = arith.constant 0 : index
    %249 = vector.load %arg7[%c0_60, %c0_61] : memref<1x32xf32, #tpu.memory_space<vmem>>, vector<1x32xf32>
    %c0_62 = arith.constant 0 : index
    %250 = memref.load %arg10[%c0_62] : memref<1xf32, #tpu.memory_space<smem>>
    %251 = tpu.iota {dimensions = array<i32: 1>} : vector<2x8xi32>
    %cst_63 = arith.constant 0.000000e+00 : f32
    %252 = vector.broadcast %cst_63 : f32 to vector<2x8xf32>
    %253 = vector.extract_strided_slice %248 {offsets = [0, 0], sizes = [2, 32], strides = [1, 1]} : vector<16x32xf32> to vector<2x32xf32>
    %254 = arith.addf %253, %245 : vector<2x32xf32>
    %255 = math.tanh %254 : vector<2x32xf32>
    %256 = vector.broadcast %249 : vector<1x32xf32> to vector<2x32xf32>
    %257 = arith.mulf %255, %256 : vector<2x32xf32>
    %cst_64 = arith.constant dense<0.000000e+00> : vector<2xf32>
    %258 = vector.multi_reduction <add>, %257, %cst_64 [1] : vector<2x32xf32> to vector<2xf32>
    %259 = vector.shape_cast %258 : vector<2xf32> to vector<2x1xf32>
    %c0_i32 = arith.constant 0 : i32
    %260 = vector.broadcast %c0_i32 : i32 to vector<2x8xi32>
    %261 = arith.cmpi eq, %251, %260 : vector<2x8xi32>
    %262 = vector.shape_cast %259 : vector<2x1xf32> to vector<2x1xf32>
    %263 = vector.broadcast %262 : vector<2x1xf32> to vector<2x8xf32>
    %264 = arith.select %261, %263, %252 : vector<2x8xi1>, vector<2x8xf32>
    %265 = vector.extract_strided_slice %248 {offsets = [2, 0], sizes = [2, 32], strides = [1, 1]} : vector<16x32xf32> to vector<2x32xf32>
    %266 = arith.addf %265, %245 : vector<2x32xf32>
    %267 = math.tanh %266 : vector<2x32xf32>
    %268 = vector.broadcast %249 : vector<1x32xf32> to vector<2x32xf32>
    %269 = arith.mulf %267, %268 : vector<2x32xf32>
    %cst_65 = arith.constant dense<0.000000e+00> : vector<2xf32>
    %270 = vector.multi_reduction <add>, %269, %cst_65 [1] : vector<2x32xf32> to vector<2xf32>
    %271 = vector.shape_cast %270 : vector<2xf32> to vector<2x1xf32>
    %c1_i32 = arith.constant 1 : i32
    %272 = vector.broadcast %c1_i32 : i32 to vector<2x8xi32>
    %273 = arith.cmpi eq, %251, %272 : vector<2x8xi32>
    %274 = vector.shape_cast %271 : vector<2x1xf32> to vector<2x1xf32>
    %275 = vector.broadcast %274 : vector<2x1xf32> to vector<2x8xf32>
    %276 = arith.select %273, %275, %264 : vector<2x8xi1>, vector<2x8xf32>
    %277 = vector.extract_strided_slice %248 {offsets = [4, 0], sizes = [2, 32], strides = [1, 1]} : vector<16x32xf32> to vector<2x32xf32>
    %278 = arith.addf %277, %245 : vector<2x32xf32>
    %279 = math.tanh %278 : vector<2x32xf32>
    %280 = vector.broadcast %249 : vector<1x32xf32> to vector<2x32xf32>
    %281 = arith.mulf %279, %280 : vector<2x32xf32>
    %cst_66 = arith.constant dense<0.000000e+00> : vector<2xf32>
    %282 = vector.multi_reduction <add>, %281, %cst_66 [1] : vector<2x32xf32> to vector<2xf32>
    %283 = vector.shape_cast %282 : vector<2xf32> to vector<2x1xf32>
    %c2_i32 = arith.constant 2 : i32
    %284 = vector.broadcast %c2_i32 : i32 to vector<2x8xi32>
    %285 = arith.cmpi eq, %251, %284 : vector<2x8xi32>
    %286 = vector.shape_cast %283 : vector<2x1xf32> to vector<2x1xf32>
    %287 = vector.broadcast %286 : vector<2x1xf32> to vector<2x8xf32>
    %288 = arith.select %285, %287, %276 : vector<2x8xi1>, vector<2x8xf32>
    %289 = vector.extract_strided_slice %248 {offsets = [6, 0], sizes = [2, 32], strides = [1, 1]} : vector<16x32xf32> to vector<2x32xf32>
    %290 = arith.addf %289, %245 : vector<2x32xf32>
    %291 = math.tanh %290 : vector<2x32xf32>
    %292 = vector.broadcast %249 : vector<1x32xf32> to vector<2x32xf32>
    %293 = arith.mulf %291, %292 : vector<2x32xf32>
    %cst_67 = arith.constant dense<0.000000e+00> : vector<2xf32>
    %294 = vector.multi_reduction <add>, %293, %cst_67 [1] : vector<2x32xf32> to vector<2xf32>
    %295 = vector.shape_cast %294 : vector<2xf32> to vector<2x1xf32>
    %c3_i32 = arith.constant 3 : i32
    %296 = vector.broadcast %c3_i32 : i32 to vector<2x8xi32>
    %297 = arith.cmpi eq, %251, %296 : vector<2x8xi32>
    %298 = vector.shape_cast %295 : vector<2x1xf32> to vector<2x1xf32>
    %299 = vector.broadcast %298 : vector<2x1xf32> to vector<2x8xf32>
    %300 = arith.select %297, %299, %288 : vector<2x8xi1>, vector<2x8xf32>
    %301 = vector.extract_strided_slice %248 {offsets = [8, 0], sizes = [2, 32], strides = [1, 1]} : vector<16x32xf32> to vector<2x32xf32>
    %302 = arith.addf %301, %245 : vector<2x32xf32>
    %303 = math.tanh %302 : vector<2x32xf32>
    %304 = vector.broadcast %249 : vector<1x32xf32> to vector<2x32xf32>
    %305 = arith.mulf %303, %304 : vector<2x32xf32>
    %cst_68 = arith.constant dense<0.000000e+00> : vector<2xf32>
    %306 = vector.multi_reduction <add>, %305, %cst_68 [1] : vector<2x32xf32> to vector<2xf32>
    %307 = vector.shape_cast %306 : vector<2xf32> to vector<2x1xf32>
    %c4_i32 = arith.constant 4 : i32
    %308 = vector.broadcast %c4_i32 : i32 to vector<2x8xi32>
    %309 = arith.cmpi eq, %251, %308 : vector<2x8xi32>
    %310 = vector.shape_cast %307 : vector<2x1xf32> to vector<2x1xf32>
    %311 = vector.broadcast %310 : vector<2x1xf32> to vector<2x8xf32>
    %312 = arith.select %309, %311, %300 : vector<2x8xi1>, vector<2x8xf32>
    %313 = vector.extract_strided_slice %248 {offsets = [10, 0], sizes = [2, 32], strides = [1, 1]} : vector<16x32xf32> to vector<2x32xf32>
    %314 = arith.addf %313, %245 : vector<2x32xf32>
    %315 = math.tanh %314 : vector<2x32xf32>
    %316 = vector.broadcast %249 : vector<1x32xf32> to vector<2x32xf32>
    %317 = arith.mulf %315, %316 : vector<2x32xf32>
    %cst_69 = arith.constant dense<0.000000e+00> : vector<2xf32>
    %318 = vector.multi_reduction <add>, %317, %cst_69 [1] : vector<2x32xf32> to vector<2xf32>
    %319 = vector.shape_cast %318 : vector<2xf32> to vector<2x1xf32>
    %c5_i32 = arith.constant 5 : i32
    %320 = vector.broadcast %c5_i32 : i32 to vector<2x8xi32>
    %321 = arith.cmpi eq, %251, %320 : vector<2x8xi32>
    %322 = vector.shape_cast %319 : vector<2x1xf32> to vector<2x1xf32>
    %323 = vector.broadcast %322 : vector<2x1xf32> to vector<2x8xf32>
    %324 = arith.select %321, %323, %312 : vector<2x8xi1>, vector<2x8xf32>
    %325 = vector.extract_strided_slice %248 {offsets = [12, 0], sizes = [2, 32], strides = [1, 1]} : vector<16x32xf32> to vector<2x32xf32>
    %326 = arith.addf %325, %245 : vector<2x32xf32>
    %327 = math.tanh %326 : vector<2x32xf32>
    %328 = vector.broadcast %249 : vector<1x32xf32> to vector<2x32xf32>
    %329 = arith.mulf %327, %328 : vector<2x32xf32>
    %cst_70 = arith.constant dense<0.000000e+00> : vector<2xf32>
    %330 = vector.multi_reduction <add>, %329, %cst_70 [1] : vector<2x32xf32> to vector<2xf32>
    %331 = vector.shape_cast %330 : vector<2xf32> to vector<2x1xf32>
    %c6_i32 = arith.constant 6 : i32
    %332 = vector.broadcast %c6_i32 : i32 to vector<2x8xi32>
    %333 = arith.cmpi eq, %251, %332 : vector<2x8xi32>
    %334 = vector.shape_cast %331 : vector<2x1xf32> to vector<2x1xf32>
    %335 = vector.broadcast %334 : vector<2x1xf32> to vector<2x8xf32>
    %336 = arith.select %333, %335, %324 : vector<2x8xi1>, vector<2x8xf32>
    %337 = vector.extract_strided_slice %248 {offsets = [14, 0], sizes = [2, 32], strides = [1, 1]} : vector<16x32xf32> to vector<2x32xf32>
    %338 = arith.addf %337, %245 : vector<2x32xf32>
    %339 = math.tanh %338 : vector<2x32xf32>
    %340 = vector.broadcast %249 : vector<1x32xf32> to vector<2x32xf32>
    %341 = arith.mulf %339, %340 : vector<2x32xf32>
    %cst_71 = arith.constant dense<0.000000e+00> : vector<2xf32>
    %342 = vector.multi_reduction <add>, %341, %cst_71 [1] : vector<2x32xf32> to vector<2xf32>
    %343 = vector.shape_cast %342 : vector<2xf32> to vector<2x1xf32>
    %c7_i32 = arith.constant 7 : i32
    %344 = vector.broadcast %c7_i32 : i32 to vector<2x8xi32>
    %345 = arith.cmpi eq, %251, %344 : vector<2x8xi32>
    %346 = vector.shape_cast %343 : vector<2x1xf32> to vector<2x1xf32>
    %347 = vector.broadcast %346 : vector<2x1xf32> to vector<2x8xf32>
    %348 = arith.select %345, %347, %336 : vector<2x8xi1>, vector<2x8xf32>
    %349 = vector.broadcast %250 : f32 to vector<2x8xf32>
    %350 = arith.addf %348, %349 : vector<2x8xf32>
    %cst_72 = arith.constant dense<0xFF800000> : vector<2xf32>
    %351 = vector.multi_reduction <maximumf>, %350, %cst_72 [1] : vector<2x8xf32> to vector<2xf32>
    %352 = vector.shape_cast %351 : vector<2xf32> to vector<2x1xf32>
    %353 = vector.broadcast %352 : vector<2x1xf32> to vector<2x8xf32>
    %354 = arith.subf %350, %353 : vector<2x8xf32>
    %355 = math.exp %354 : vector<2x8xf32>
    %cst_73 = arith.constant dense<0.000000e+00> : vector<2xf32>
    %356 = vector.multi_reduction <add>, %355, %cst_73 [1] : vector<2x8xf32> to vector<2xf32>
    %357 = vector.shape_cast %356 : vector<2xf32> to vector<2x1xf32>
    %358 = vector.broadcast %357 : vector<2x1xf32> to vector<2x8xf32>
    %359 = arith.divf %355, %358 : vector<2x8xf32>
    %cst_74 = arith.constant 0.000000e+00 : f32
    %360 = vector.broadcast %cst_74 : f32 to vector<2x32xf32>
    %361 = vector.extract_strided_slice %359 {offsets = [0, 0], sizes = [2, 1], strides = [1, 1]} : vector<2x8xf32> to vector<2x1xf32>
    %362 = vector.broadcast %361 : vector<2x1xf32> to vector<2x32xf32>
    %363 = arith.mulf %362, %36 : vector<2x32xf32>
    %364 = arith.addf %360, %363 : vector<2x32xf32>
    %365 = vector.extract_strided_slice %359 {offsets = [0, 1], sizes = [2, 1], strides = [1, 1]} : vector<2x8xf32> to vector<2x1xf32>
    %366 = vector.broadcast %365 : vector<2x1xf32> to vector<2x32xf32>
    %367 = arith.mulf %366, %65 : vector<2x32xf32>
    %368 = arith.addf %364, %367 : vector<2x32xf32>
    %369 = vector.extract_strided_slice %359 {offsets = [0, 2], sizes = [2, 1], strides = [1, 1]} : vector<2x8xf32> to vector<2x1xf32>
    %370 = vector.broadcast %369 : vector<2x1xf32> to vector<2x32xf32>
    %371 = arith.mulf %370, %94 : vector<2x32xf32>
    %372 = arith.addf %368, %371 : vector<2x32xf32>
    %373 = vector.extract_strided_slice %359 {offsets = [0, 3], sizes = [2, 1], strides = [1, 1]} : vector<2x8xf32> to vector<2x1xf32>
    %374 = vector.broadcast %373 : vector<2x1xf32> to vector<2x32xf32>
    %375 = arith.mulf %374, %123 : vector<2x32xf32>
    %376 = arith.addf %372, %375 : vector<2x32xf32>
    %377 = vector.extract_strided_slice %359 {offsets = [0, 4], sizes = [2, 1], strides = [1, 1]} : vector<2x8xf32> to vector<2x1xf32>
    %378 = vector.broadcast %377 : vector<2x1xf32> to vector<2x32xf32>
    %379 = arith.mulf %378, %152 : vector<2x32xf32>
    %380 = arith.addf %376, %379 : vector<2x32xf32>
    %381 = vector.extract_strided_slice %359 {offsets = [0, 5], sizes = [2, 1], strides = [1, 1]} : vector<2x8xf32> to vector<2x1xf32>
    %382 = vector.broadcast %381 : vector<2x1xf32> to vector<2x32xf32>
    %383 = arith.mulf %382, %181 : vector<2x32xf32>
    %384 = arith.addf %380, %383 : vector<2x32xf32>
    %385 = vector.extract_strided_slice %359 {offsets = [0, 6], sizes = [2, 1], strides = [1, 1]} : vector<2x8xf32> to vector<2x1xf32>
    %386 = vector.broadcast %385 : vector<2x1xf32> to vector<2x32xf32>
    %387 = arith.mulf %386, %210 : vector<2x32xf32>
    %388 = arith.addf %384, %387 : vector<2x32xf32>
    %389 = vector.extract_strided_slice %359 {offsets = [0, 7], sizes = [2, 1], strides = [1, 1]} : vector<2x8xf32> to vector<2x1xf32>
    %390 = vector.broadcast %389 : vector<2x1xf32> to vector<2x32xf32>
    %391 = arith.mulf %390, %239 : vector<2x32xf32>
    %392 = arith.addf %388, %391 : vector<2x32xf32>
    %c0_75 = arith.constant 0 : index
    %c0_76 = arith.constant 0 : index
    %393 = vector.load %arg8[%c0_75, %c0_76] : memref<32x5xf32, #tpu.memory_space<vmem>>, vector<32x5xf32>
    %cst_77 = arith.constant dense<0.000000e+00> : vector<2x5xf32>
    %394 = tpu.matmul %392, %393, %cst_77 {dimension_numbers = #tpu.dot_dimension_numbers<[1], [0], [0], [1], [0, 0, 1, 1], [], []>} : vector<2x32xf32>, vector<32x5xf32>, vector<2x5xf32> -> vector<2x5xf32>
    %c0_78 = arith.constant 0 : index
    %c0_79 = arith.constant 0 : index
    %395 = vector.load %arg9[%c0_78, %c0_79] : memref<1x5xf32, #tpu.memory_space<vmem>>, vector<1x5xf32>
    %396 = vector.broadcast %395 : vector<1x5xf32> to vector<2x5xf32>
    %397 = arith.addf %394, %396 : vector<2x5xf32>
    %c0_80 = arith.constant 0 : index
    %c0_81 = arith.constant 0 : index
    %398 = vector.load %arg12[%c0_80, %c0_81] : memref<2x5xf32, #tpu.memory_space<vmem>>, vector<2x5xf32>
    tpu.vector_store %arg12[%c0_80, %c0_81], %397 {strides = array<i32>} : memref<2x5xf32, #tpu.memory_space<vmem>>, vector<2x5xf32>,
    %cst_82 = arith.constant dense<0xFF800000> : vector<2xf32>
    %399 = vector.multi_reduction <maximumf>, %397, %cst_82 [1] : vector<2x5xf32> to vector<2xf32>
    %400 = vector.shape_cast %399 : vector<2xf32> to vector<2x1xf32>
    %401 = vector.broadcast %400 : vector<2x1xf32> to vector<2x5xf32>
    %402 = arith.subf %397, %401 : vector<2x5xf32>
    %403 = math.exp %402 : vector<2x5xf32>
    %cst_83 = arith.constant dense<0.000000e+00> : vector<2xf32>
    %404 = vector.multi_reduction <add>, %403, %cst_83 [1] : vector<2x5xf32> to vector<2xf32>
    %405 = vector.shape_cast %404 : vector<2xf32> to vector<2x1xf32>
    %406 = math.log %405 : vector<2x1xf32>
    %407 = arith.addf %400, %406 : vector<2x1xf32>
    %408 = tpu.iota {dimensions = array<i32: 1>} : vector<2x5xi32>
    %c0_84 = arith.constant 0 : index
    %c0_85 = arith.constant 0 : index
    %409 = vector.load %arg11[%c0_84, %c0_85] : memref<2x1xi32, #tpu.memory_space<vmem>>, vector<2x1xi32>
    %410 = vector.broadcast %409 : vector<2x1xi32> to vector<2x5xi32>
    %411 = arith.cmpi eq, %408, %410 : vector<2x5xi32>
    %412 = arith.extui %411 : vector<2x5xi1> to vector<2x5xi32>
    %413 = arith.sitofp %412 : vector<2x5xi32> to vector<2x5xf32>
    %414 = arith.mulf %397, %413 : vector<2x5xf32>
    %cst_86 = arith.constant dense<0.000000e+00> : vector<2xf32>
    %415 = vector.multi_reduction <add>, %414, %cst_86 [1] : vector<2x5xf32> to vector<2xf32>
    %416 = vector.shape_cast %415 : vector<2xf32> to vector<2x1xf32>
    %417 = arith.subf %407, %416 : vector<2x1xf32>
    %cst_87 = arith.constant dense<0.000000e+00> : vector<1xf32>
    %418 = vector.multi_reduction <add>, %417, %cst_87 [0] : vector<2x1xf32> to vector<1xf32>
    %419 = vector.shape_cast %418 : vector<1xf32> to vector<1x1xf32>
    %cst_88 = arith.constant 5.000000e-01 : f32
    %420 = vector.broadcast %cst_88 : f32 to vector<1x1xf32>
    %421 = arith.mulf %419, %420 : vector<1x1xf32>
    %c0_89 = arith.constant 0 : index
    %c0_90 = arith.constant 0 : index
    %422 = vector.load %arg13[%c0_89, %c0_90] : memref<1x1xf32, #tpu.memory_space<vmem>>, vector<1x1xf32>
    tpu.vector_store %arg13[%c0_89, %c0_90], %421 {strides = array<i32>} : memref<1x1xf32, #tpu.memory_space<vmem>>, vector<1x1xf32>,
    return
  }
}

</mosaic_0001>

<bundles_post_ra>
// kernel: tpu_custom_call.1
= control target key start
LH: loop header
LB: loop body
LE: loop exit
PB: predicated region body
PF: predicated region fallthrough
CT: control target
= control target key end

     0   :  { %20 = vsyncpa [#allocation5], 0  ;;  %s1698_s0 = inlined_call_operand.hbm [shape: f32[16,16], index: 0, kind: input, shape index: {}]   ;;  %s1699_s1 = inlined_call_operand.hbm [shape: f32[16,128], index: 1, kind: input, shape index: {}]   ;;  %s1700_s2 = inlined_call_operand.vmem [shape: f32[32,128], index: 2, kind: input, shape index: {}]   ;;  %s1701_s3 = inlined_call_operand.vmem [shape: f32[1,128], index: 3, kind: input, shape index: {}]   ;;  %s1702_s4 = inlined_call_operand.hbm [shape: f32[32,32], index: 4, kind: input, shape index: {}]   ;;  %s1703_s5 = inlined_call_operand.vmem [shape: f32[1,32], index: 5, kind: input, shape index: {}]   ;;  %s1704_s6 = inlined_call_operand.hbm [shape: f32[32,32], index: 6, kind: input, shape index: {}]   ;;  %s1705_s7 = inlined_call_operand.vmem [shape: f32[1,32], index: 7, kind: input, shape index: {}]   ;;  %s1706_s8 = inlined_call_operand.vmem [shape: f32[32,5], index: 8, kind: input, shape index: {}]   ;;  %s1707_s9 = inlined_call_operand.vmem [shape: f32[1,5], index: 9, kind: input, shape index: {}]   ;;  %s1708_s10 = inlined_call_operand.<no memory space> [shape: f32[1], index: 10, kind: input, shape index: {}]   ;;  %s1709_s11 = inlined_call_operand.vmem [shape: s32[2,1], index: 11, kind: input, shape index: {}]   ;;  %s1710_s12 = inlined_call_operand.hbm [shape: f32[2,5], index: 12, kind: output, shape index: {0}]   ;;  %s1711_s13 = inlined_call_operand.hbm [shape: f32[1,1], index: 13, kind: output, shape index: {1}]  }
   0x1   :  { %21 = vsyncpa [#allocation8], 0 }
   0x2   :  { %22 = vsyncpa [#allocation11], 0 }
   0x3   :  { %23 = vsyncpa [#allocation6], 0 }
   0x4   :  { %24 = vsyncpa [#allocation14], 0  ;;  %s42_s27 = sshll.u32 %s1699_s1, 4  ;;  %s1407_s28 = smov [#allocation7]   ;;  %s43_s27 = int_to_ptr.hbm [resolvable:$true] %s42_s27 }
   0x5   :  { %s44_s29 = sshll.u32 %s1407_s28, 4  ;;  %s29_s15 = sshll.u32 %s1698_s0, 4  ;;  %s45_s29 = int_to_ptr.vmem [resolvable:$true] %s44_s29  ;;  %s30_s15 = int_to_ptr.hbm [resolvable:$true] %s29_s15 }
   0x6   :  { %s1408_s16 = smov 128   ;;  %s1409_s17 = smov 8  }
   0x7   :  { %50 = dma.hbm_to_vmem [thread:$0]  %s43_s27, 256, %s45_s29, [#allocation8], %s1408_s16, %s1408_s16, %s1409_s17  }
   0x8   :  { %s1410_s18 = smov [#allocation4]   ;;  %s59_s22 = sshll.u32 %s1702_s4, 4  ;;  %s60_s22 = int_to_ptr.hbm [resolvable:$true] %s59_s22 }
   0x9   :  { %s31_s19 = sshll.u32 %s1410_s18, 4  ;;  %s74_s24 = sshll.u32 %s1704_s6, 4  ;;  %s32_s19 = int_to_ptr.vmem [resolvable:$true] %s31_s19  ;;  %s75_s24 = int_to_ptr.hbm [resolvable:$true] %s74_s24 }
   0xa   :  { %37 = dma.hbm_to_vmem [thread:$0]  %s30_s15, 256, %s32_s19, [#allocation5], %s1408_s16, %s1408_s16, %s1409_s17  }
   0xb   :  { %s1411_s25 = smov [#allocation9]   ;;  %s1412_s0 = smov [#allocation10]  }
   0xc   :  { %s61_s26 = sshll.u32 %s1411_s25, 4  ;;  %s76_s27 = sshll.u32 %s1412_s0, 4  ;;  %s62_s26 = int_to_ptr.vmem [resolvable:$true] %s61_s26  ;;  %s77_s27 = int_to_ptr.vmem [resolvable:$true] %s76_s27 }
   0xd   :  { %67 = dma.hbm_to_vmem [thread:$0]  %s60_s22, 512, %s62_s26, [#allocation8], %s1408_s16, %s1408_s16, %s1409_s17  }
   0xe   :  { %82 = dma.hbm_to_vmem [thread:$0]  %s75_s24, 512, %s77_s27, [#allocation11], %s1408_s16, %s1408_s16, %s1409_s17  }
   0xf   :  { %1397 = dma.done.wait [#allocation5], 256  }
  0x10   :  { %1398 = vsyncadd [#allocation5], 4294967040 }
  0x11   :  { %1399 = dma.done.wait [#allocation8], 768  }
  0x12   :  { %1400 = vsyncadd [#allocation8], 4294966528 }
  0x13   :  { %1401 = dma.done.wait [#allocation11], 512  }
  0x14   :  { %1402 = vsyncadd [#allocation11], 4294966784  ;;  %v112_v0 = vld [vmem:[%s1700_s2 + $0x18] sm:$0xff]  ;;  %v116_v1 = vld [vmem:[#allocation7 + $0x8] sm:$0xff]  ;;  %vm121_vm0 = vcmask 130048   ;;  %v1413_v7 = vmov 0.0  }
  0x15   :  { %v111_v2 = vld [vmem:[%s1700_s2 + $0x10] sm:$0xff]  ;;  %167 = vmatpush.msra.mxu1 %v112_v0  ;;  %142 = vmatpush.msra.mxu0 %v116_v1  ;;  %v115_v3 = vld [vmem:[#allocation7] sm:$0xff]  ;;  %v110_v5 = vld [vmem:[%s1700_s2 + $0x8] sm:$0xff]  ;;  %s1414_s18 = smov 64   ;;  %vm217_vm5 = vcmask 254976   ;;  %vm151_vm6 = vcmask 261120  }
  0x16   :  { %v113_v4 = vld [vmem:[#allocation4] sm:$0xff]  ;;  %233 = vmatpush.msra.mxu2 %v112_v0  ;;  %308 = vmatpush.msra.mxu3 %v112_v0  ;;  %v109_v6 = vld [vmem:[%s1700_s2] sm:$0xff]  ;;  %s1082_s29 = sshll.u32 %s1710_s12, 4  ;;  %s1424_s30 = smov [#allocation12]   ;;  %s1083_s29 = int_to_ptr.hbm [resolvable:$true] %s1082_s29 }
  0x17   :  { %168 = vmatpush.msra.mxu1 %v111_v2  ;;  %143 = vmatpush.msra.mxu0 %v115_v3  ;;  %v1525_v8 = vld [vmem:[%s1701_s3] ss:$0 sm:$0xff]  ;;  %s1415_s3 = smov 32   ;;  %s1080_s14 = sshll.u32 %s1424_s30, 4  ;;  %s1081_s14 = int_to_ptr.vmem [resolvable:$true] %s1080_s14 }
  0x18   :  { %1110 = vmatmul.msk.f32.vlgmr.msra.gmra.mxu0 %vm121_vm0, %v113_v4  ;;  %234 = vmatpush.msra.mxu2 %v111_v2  ;;  %s1425_s12 = smov [#allocation13]   ;;  %s1093_s17 = sshll.u32 %s1711_s13, 4  ;;  %s1094_s17 = int_to_ptr.hbm [resolvable:$true] %s1093_s17 }
  0x19   :  { %169 = vmatpush.msra.mxu1 %v110_v5  ;;  %309 = vmatpush.msra.mxu3 %v111_v2  ;;  %s1091_s15 = sshll.u32 %s1425_s12, 4  ;;  %s1092_s15 = int_to_ptr.vmem [resolvable:$true] %s1091_s15 }
  0x1a   :  { %235 = vmatpush.msra.mxu2 %v110_v5  ;;  %600 = vmatpush.msrb.mxu0 %v112_v0 }
  0x1b   :  { %170 = vmatpush.msra.mxu1 %v109_v6  ;;  %310 = vmatpush.msra.mxu3 %v110_v5 }
  0x1c   :  { %171 = vmatmul.f32.vlgmr.msra.gmra.mxu1 %v1413_v7  ;;  %236 = vmatpush.msra.mxu2 %v109_v6 }
  0x1d   :  { %311 = vmatpush.msra.mxu3 %v109_v6  ;;  %383 = vmatpush.msrb.mxu1 %v112_v0 }
  0x1e   :  { %458 = vmatpush.msrb.mxu2 %v112_v0  ;;  %601 = vmatpush.msrb.mxu0 %v111_v2 }
  0x1f   :  { %526 = vmatpush.msrb.mxu3 %v112_v0  ;;  %384 = vmatpush.msrb.mxu1 %v111_v2 }
  0x20   :  { %459 = vmatpush.msrb.mxu2 %v111_v2  ;;  %602 = vmatpush.msrb.mxu0 %v110_v5 }
  0x21   :  { %527 = vmatpush.msrb.mxu3 %v111_v2  ;;  %385 = vmatpush.msrb.mxu1 %v110_v5 }
  0x22   :  { %460 = vmatpush.msrb.mxu2 %v110_v5  ;;  %603 = vmatpush.msrb.mxu0 %v109_v6 }
  0x23   :  { %528 = vmatpush.msrb.mxu3 %v110_v5  ;;  %386 = vmatpush.msrb.mxu1 %v109_v6 }
  0x24   :  { %461 = vmatpush.msrb.mxu2 %v109_v6 }
  0x25   :  { %529 = vmatpush.msrb.mxu3 %v109_v6  ;;  %674 = vmatpush.msra.mxu1 %v112_v0 }
  0x27   :  { %675 = vmatpush.msra.mxu1 %v111_v2 }
  0x29   :  { %676 = vmatpush.msra.mxu1 %v110_v5 }
  0x2b   :  { %677 = vmatpush.msra.mxu1 %v109_v6 }
  0x95   :  { %v145_v9 = vpop.f32.mrf.mxu0 }
  0x96   :  { %v1528_v10 = vadd.f32 %v1525_v8, %v145_v9 }
  0x99   :  { %v172_v11 = vpop.f32.mrf.mxu1 }
  0x9a   :  { %v175_v12 = vadd.f32 %v172_v11, %v1528_v10 }
  0x9c   :  { %1165 = vtanh.f32 %v175_v12  ;;  %v1112_v14 = vmul.f32 -1.442695, %v175_v12 }
  0x9e   :  { %1167 = vpow2.f32 %v1112_v14 }
  0xa2   :  { %v1166_v13 = vpop.eup %1165 }
  0xa3   :  { %198 = vrot.lane.b32.xlu0 %v1166_v13, %s1414_s18 }
  0xa4   :  { %v1168_v15 = vpop.eup %1167 }
  0xa5   :  { %v179_v16 = vadd.f32 1.0, %v1168_v15 }
  0xa7   :  { %1169 = vrcp.f32 %v179_v16  ;;  %v191_v22 = vand.u32 2147483648, %v179_v16  ;;  %vm185_vm2 = vweird.f32 %v179_v16  ;;  %v189_v23 = vand.u32 2147483647, %v179_v16 }
  0xa9   :  { %v192_v25 = vor.u32 1.1754944e-38, %v191_v22  ;;  %vm190_vm4 = vcmp.eq.f32.partialorder %v189_v23, 8.507059e+37 }
  0xad   :  { %v1170_v17 = vpop.eup %1169 }
  0xae   :  { %v181_v18 = vmul.f32 %v1170_v17, %v179_v16  ;;  %vm186_vm1 = vweird.f32 %v1170_v17 }
  0xaf   :  { %vm187_vm3 = vmor %vm185_vm2, %vm186_vm1 }
  0xb0   :  { %v182_v19 = vsub.f32 1.0, %v181_v18 }
  0xb2   :  { %v183_v20 = vmul.f32 %v1170_v17, %v182_v19 }
  0xb4   :  { %v184_v21 = vadd.f32 %v1170_v17, %v183_v20 }
  0xb6   :  { %v188_v24 = vsel %vm187_vm3, %v1170_v17, %v184_v21 }
  0xb7   :  { %v193_v27 = vsel %vm190_vm4, %v192_v25, %v188_v24 }
  0xb8   :  { %v196_v29 = vmul.f32 0.0, %v193_v27 }
 0x115   :  { %v199_v26 = vpop.permute.xlu0 %198 }
 0x116   :  { %v201_v28 = vmul.f32 %v199_v26, %v193_v27 }
 0x118   :  { %203 = vrot.lane.b32.xlu0 %v201_v28, %s1415_s3 }
 0x18a   :  { %v204_v30 = vpop.permute.xlu0 %203 }
 0x18b   :  { %v206_v31 = vadd.f32 %v204_v30, %v196_v29 }
 0x18d   :  { %1171 = vtanh.f32 %v206_v31  ;;  %v266_v55 = vrot.slane %v206_v31, 6 }
 0x193   :  { %v1172_v32 = vpop.eup %1171 }
 0x194   :  { %209 = vrot.lane.b32.xlu1 %v1172_v32, %s1414_s18 }
 0x206   :  { %v210_v33 = vpop.permute.xlu1 %209 }
 0x207   :  { %v1534_v34 = vmul.f32 %v210_v33, %v193_v27 }
 0x209   :  { %214 = vrot.lane.b32.xlu1 %v1534_v34, %s1415_s3 }
 0x27b   :  { %v215_v35 = vpop.permute.xlu1 %214 }
 0x27c   :  { %218 = vst.msk [vmem:[#allocation2] sm:$0x3] %vm217_vm5, %v215_v35  ;;  %1113 = vmatmul.msk.f32.vlgmr.msra.gmra.mxu2 %vm151_vm6, %v215_v35 }
 0x2ff   :  { %v238_v36 = vpop.f32.mrf.mxu2 }
 0x300   :  { %v242_v37 = vrot.slane %v238_v36, 6 }
 0x302   :  { %v244_v38 = vadd.f32 %v242_v37, %v1528_v10 }
 0x304   :  { %1173 = vtanh.f32 %v244_v38  ;;  %v1114_v40 = vmul.f32 -1.442695, %v244_v38 }
 0x306   :  { %1175 = vpow2.f32 %v1114_v40 }
 0x30a   :  { %v1174_v39 = vpop.eup %1173 }
 0x30b   :  { %270 = vrot.lane.b32.xlu2 %v1174_v39, %s1414_s18 }
 0x30c   :  { %v1176_v41 = vpop.eup %1175 }
 0x30d   :  { %v248_v42 = vadd.f32 1.0, %v1176_v41 }
 0x30f   :  { %1177 = vrcp.f32 %v248_v42  ;;  %v260_v48 = vand.u32 2147483648, %v248_v42  ;;  %vm254_vm8 = vweird.f32 %v248_v42  ;;  %v258_v49 = vand.u32 2147483647, %v248_v42 }
 0x311   :  { %v261_v51 = vor.u32 1.1754944e-38, %v260_v48  ;;  %vm259_vm10 = vcmp.eq.f32.partialorder %v258_v49, 8.507059e+37 }
 0x315   :  { %v1178_v43 = vpop.eup %1177 }
 0x316   :  { %v250_v44 = vmul.f32 %v1178_v43, %v248_v42  ;;  %vm255_vm7 = vweird.f32 %v1178_v43 }
 0x317   :  { %vm256_vm9 = vmor %vm254_vm8, %vm255_vm7 }
 0x318   :  { %v251_v45 = vsub.f32 1.0, %v250_v44 }
 0x31a   :  { %v252_v46 = vmul.f32 %v1178_v43, %v251_v45 }
 0x31c   :  { %v253_v47 = vadd.f32 %v1178_v43, %v252_v46 }
 0x31e   :  { %v257_v50 = vsel %vm256_vm9, %v1178_v43, %v253_v47 }
 0x31f   :  { %v262_v53 = vsel %vm259_vm10, %v261_v51, %v257_v50 }
 0x320   :  { %v268_v56 = vmul.f32 %v266_v55, %v262_v53 }
 0x365   :  { %v271_v52 = vpop.permute.xlu2 %270 }
 0x366   :  { %v273_v54 = vmul.f32 %v271_v52, %v262_v53 }
 0x368   :  { %275 = vrot.lane.b32.xlu2 %v273_v54, %s1415_s3 }
 0x3c2   :  { %v276_v57 = vpop.permute.xlu2 %275 }
 0x3c3   :  { %v278_v58 = vadd.f32 %v276_v57, %v268_v56 }
 0x3c5   :  { %1179 = vtanh.f32 %v278_v58  ;;  %v341_v22 = vrot.slane %v278_v58, 6  ;;  %v114_v58 = vld [vmem:[#allocation4 + $0x8] sm:$0xff] }
 0x3c6   :  { %1111 = vmatmul.msk.f32.gmra.mxu0 %vm121_vm0, %v114_v58 }
 0x3cb   :  { %v1180_v59 = vpop.eup %1179 }
 0x3cc   :  { %281 = vrot.lane.b32.xlu0 %v1180_v59, %s1414_s18 }
 0x43e   :  { %v282_v60 = vpop.permute.xlu0 %281 }
 0x43f   :  { %v1544_v61 = vmul.f32 %v282_v60, %v262_v53 }
 0x441   :  { %v291_v62 = vrot.slane %v1544_v61, 2 }
 0x443   :  { %292 = vrot.lane.b32.xlu1 %v291_v62, %s1415_s3  ;;  %v148_v60 = vpop.f32.mrf.mxu0 }
 0x444   :  { %v1569_v62 = vadd.f32 %v1525_v8, %v148_v60 }
 0x4b5   :  { %v293_v63 = vpop.permute.xlu1 %292 }
 0x4b6   :  { %1115 = vmatmul.msk.f32.vlgmr.msra.gmra.mxu3 %vm151_vm6, %v293_v63 }
 0x539   :  { %v313_v0 = vpop.f32.mrf.mxu3 }
 0x53a   :  { %v317_v1 = vrot.slane %v313_v0, 4 }
 0x53c   :  { %v319_v2 = vadd.f32 %v317_v1, %v1528_v10 }
 0x53e   :  { %1181 = vtanh.f32 %v319_v2  ;;  %v1116_v4 = vmul.f32 -1.442695, %v319_v2 }
 0x540   :  { %1183 = vpow2.f32 %v1116_v4 }
 0x544   :  { %v1182_v3 = vpop.eup %1181 }
 0x545   :  { %345 = vrot.lane.b32.xlu2 %v1182_v3, %s1414_s18 }
 0x546   :  { %v1184_v5 = vpop.eup %1183 }
 0x547   :  { %v323_v6 = vadd.f32 1.0, %v1184_v5 }
 0x549   :  { %1185 = vrcp.f32 %v323_v6  ;;  %v335_v15 = vand.u32 2147483648, %v323_v6  ;;  %vm329_vm12 = vweird.f32 %v323_v6  ;;  %v333_v16 = vand.u32 2147483647, %v323_v6 }
 0x54b   :  { %v336_v18 = vor.u32 1.1754944e-38, %v335_v15  ;;  %vm334_vm14 = vcmp.eq.f32.partialorder %v333_v16, 8.507059e+37 }
 0x54f   :  { %v1186_v9 = vpop.eup %1185 }
 0x550   :  { %v325_v11 = vmul.f32 %v1186_v9, %v323_v6  ;;  %vm330_vm11 = vweird.f32 %v1186_v9 }
 0x551   :  { %vm331_vm13 = vmor %vm329_vm12, %vm330_vm11 }
 0x552   :  { %v326_v12 = vsub.f32 1.0, %v325_v11 }
 0x554   :  { %v327_v13 = vmul.f32 %v1186_v9, %v326_v12 }
 0x556   :  { %v328_v14 = vadd.f32 %v1186_v9, %v327_v13 }
 0x558   :  { %v332_v17 = vsel %vm331_vm13, %v1186_v9, %v328_v14 }
 0x559   :  { %v337_v20 = vsel %vm334_vm14, %v336_v18, %v332_v17 }
 0x55a   :  { %v343_v23 = vmul.f32 %v341_v22, %v337_v20 }
 0x59f   :  { %v346_v19 = vpop.permute.xlu2 %345 }
 0x5a0   :  { %v348_v21 = vmul.f32 %v346_v19, %v337_v20 }
 0x5a2   :  { %350 = vrot.lane.b32.xlu0 %v348_v21, %s1415_s3 }
 0x614   :  { %v351_v24 = vpop.permute.xlu0 %350 }
 0x615   :  { %v353_v25 = vadd.f32 %v351_v24, %v343_v23 }
 0x617   :  { %1187 = vtanh.f32 %v353_v25  ;;  %v416_v50 = vrot.slane %v353_v25, 6 }
 0x61d   :  { %v1188_v26 = vpop.eup %1187 }
 0x61e   :  { %356 = vrot.lane.b32.xlu1 %v1188_v26, %s1414_s18 }
 0x690   :  { %v357_v27 = vpop.permute.xlu1 %356 }
 0x691   :  { %v1553_v28 = vmul.f32 %v357_v27, %v337_v20 }
 0x693   :  { %v366_v29 = vrot.slane %v1553_v28, 4 }
 0x695   :  { %367 = vrot.lane.b32.xlu2 %v366_v29, %s1415_s3 }
 0x6ef   :  { %v368_v30 = vpop.permute.xlu2 %367 }
 0x6f0   :  { %1117 = vmatmul.msk.f32.vlgmr.msrb.gmra.mxu1 %vm151_vm6, %v368_v30 }
 0x76d   :  { %v388_v31 = vpop.f32.mrf.mxu1 }
 0x76e   :  { %v392_v32 = vrot.slane %v388_v31, 2 }
 0x770   :  { %v394_v33 = vadd.f32 %v392_v32, %v1528_v10 }
 0x772   :  { %1189 = vtanh.f32 %v394_v33  ;;  %v1118_v36 = vmul.f32 -1.442695, %v394_v33 }
 0x774   :  { %1191 = vpow2.f32 %v1118_v36 }
 0x778   :  { %v1190_v35 = vpop.eup %1189 }
 0x779   :  { %420 = vrot.lane.b32.xlu0 %v1190_v35, %s1414_s18 }
 0x77a   :  { %v1192_v37 = vpop.eup %1191 }
 0x77b   :  { %v398_v38 = vadd.f32 1.0, %v1192_v37 }
 0x77d   :  { %1193 = vrcp.f32 %v398_v38  ;;  %v410_v44 = vand.u32 2147483648, %v398_v38  ;;  %vm404_vm1 = vweird.f32 %v398_v38  ;;  %v408_v45 = vand.u32 2147483647, %v398_v38 }
 0x77f   :  { %v411_v46 = vor.u32 1.1754944e-38, %v410_v44  ;;  %vm409_vm3 = vcmp.eq.f32.partialorder %v408_v45, 8.507059e+37 }
 0x783   :  { %v1194_v39 = vpop.eup %1193 }
 0x784   :  { %v400_v40 = vmul.f32 %v1194_v39, %v398_v38  ;;  %vm405_vm15 = vweird.f32 %v1194_v39 }
 0x785   :  { %vm406_vm2 = vmor %vm404_vm1, %vm405_vm15 }
 0x786   :  { %v401_v41 = vsub.f32 1.0, %v400_v40 }
 0x788   :  { %v402_v42 = vmul.f32 %v1194_v39, %v401_v41 }
 0x78a   :  { %v403_v43 = vadd.f32 %v1194_v39, %v402_v42 }
 0x78c   :  { %v407_v10 = vsel %vm406_vm2, %v1194_v39, %v403_v43 }
 0x78d   :  { %v412_v48 = vsel %vm409_vm3, %v411_v46, %v407_v10 }
 0x78e   :  { %v418_v51 = vmul.f32 %v416_v50, %v412_v48 }
 0x7eb   :  { %v421_v47 = vpop.permute.xlu0 %420 }
 0x7ec   :  { %v423_v49 = vmul.f32 %v421_v47, %v412_v48 }
 0x7ee   :  { %425 = vrot.lane.b32.xlu1 %v423_v49, %s1415_s3 }
 0x860   :  { %v426_v52 = vpop.permute.xlu1 %425 }
 0x861   :  { %v428_v53 = vadd.f32 %v426_v52, %v418_v51 }
 0x863   :  { %1195 = vtanh.f32 %v428_v53  ;;  %v488_v19 = vrot.slane %v428_v53, 6 }
 0x869   :  { %v1196_v54 = vpop.eup %1195 }
 0x86a   :  { %431 = vrot.lane.b32.xlu2 %v1196_v54, %s1414_s18 }
 0x8c4   :  { %v432_v55 = vpop.permute.xlu2 %431 }
 0x8c5   :  { %v1562_v56 = vmul.f32 %v432_v55, %v412_v48 }
 0x8c7   :  { %v441_v57 = vrot.slane %v1562_v56, 6 }
 0x8c9   :  { %442 = vrot.lane.b32.xlu0 %v441_v57, %s1415_s3 }
 0x93b   :  { %v443_v59 = vpop.permute.xlu0 %442 }
 0x93c   :  { %1119 = vmatmul.msk.f32.vlgmr.msrb.gmra.mxu2 %vm151_vm6, %v443_v59 }
 0x9bf   :  { %v463_v63 = vpop.f32.mrf.mxu2 }
 0x9c0   :  { %v466_v0 = vadd.f32 %v463_v63, %v1569_v62 }
 0x9c2   :  { %1197 = vtanh.f32 %v466_v0  ;;  %v1120_v2 = vmul.f32 -1.442695, %v466_v0 }
 0x9c4   :  { %1199 = vpow2.f32 %v1120_v2 }
 0x9c8   :  { %v1198_v1 = vpop.eup %1197 }
 0x9c9   :  { %492 = vrot.lane.b32.xlu1 %v1198_v1, %s1414_s18 }
 0x9ca   :  { %v1200_v3 = vpop.eup %1199 }
 0x9cb   :  { %v470_v4 = vadd.f32 1.0, %v1200_v3 }
 0x9cd   :  { %1201 = vrcp.f32 %v470_v4  ;;  %v482_v8 = vand.u32 2147483648, %v470_v4  ;;  %vm476_vm4 = vweird.f32 %v470_v4  ;;  %v480_v13 = vand.u32 2147483647, %v470_v4 }
 0x9cf   :  { %v483_v15 = vor.u32 1.1754944e-38, %v482_v8  ;;  %vm481_vm8 = vcmp.eq.f32.partialorder %v480_v13, 8.507059e+37 }
 0x9d3   :  { %v1202_v5 = vpop.eup %1201 }
 0x9d4   :  { %v472_v6 = vmul.f32 %v1202_v5, %v470_v4  ;;  %vm477_vm0 = vweird.f32 %v1202_v5 }
 0x9d5   :  { %vm478_vm7 = vmor %vm476_vm4, %vm477_vm0 }
 0x9d6   :  { %v473_v9 = vsub.f32 1.0, %v472_v6 }
 0x9d8   :  { %v474_v11 = vmul.f32 %v1202_v5, %v473_v9 }
 0x9da   :  { %v475_v12 = vadd.f32 %v1202_v5, %v474_v11 }
 0x9dc   :  { %v479_v14 = vsel %vm478_vm7, %v1202_v5, %v475_v12  ;;  %vm289_vm7 = vcmask 257026  }
 0x9dd   :  { %v484_v17 = vsel %vm481_vm8, %v483_v15, %v479_v14  ;;  %vm364_vm8 = vcmask 259076  }
 0x9de   :  { %v490_v20 = vmul.f32 %v488_v19, %v484_v17 }
 0xa3b   :  { %v493_v16 = vpop.permute.xlu1 %492 }
 0xa3c   :  { %v495_v18 = vmul.f32 %v493_v16, %v484_v17 }
 0xa3e   :  { %497 = vrot.lane.b32.xlu2 %v495_v18, %s1415_s3 }
 0xa98   :  { %v498_v21 = vpop.permute.xlu2 %497 }
 0xa99   :  { %v500_v22 = vadd.f32 %v498_v21, %v490_v20 }
 0xa9b   :  { %1203 = vtanh.f32 %v500_v22  ;;  %v559_v47 = vrot.slane %v500_v22, 6 }
 0xaa1   :  { %v1204_v23 = vpop.eup %1203 }
 0xaa2   :  { %503 = vrot.lane.b32.xlu0 %v1204_v23, %s1414_s18 }
 0xb14   :  { %v504_v24 = vpop.permute.xlu0 %503 }
 0xb15   :  { %v1575_v25 = vmul.f32 %v504_v24, %v484_v17 }
 0xb17   :  { %508 = vrot.lane.b32.xlu1 %v1575_v25, %s1415_s3 }
 0xb89   :  { %v509_v26 = vpop.permute.xlu1 %508 }
 0xb8a   :  { %511 = vst.msk [vmem:[#allocation2 + $0x8] sm:$0x3] %vm217_vm5, %v509_v26  ;;  %1121 = vmatmul.msk.f32.vlgmr.msrb.gmra.mxu3 %vm151_vm6, %v509_v26 }
 0xc0d   :  { %v531_v27 = vpop.f32.mrf.mxu3 }
 0xc0e   :  { %v535_v29 = vrot.slane %v531_v27, 6 }
 0xc10   :  { %v537_v30 = vadd.f32 %v535_v29, %v1569_v62 }
 0xc12   :  { %1205 = vtanh.f32 %v537_v30  ;;  %v1122_v32 = vmul.f32 -1.442695, %v537_v30 }
 0xc14   :  { %1207 = vpow2.f32 %v1122_v32 }
 0xc18   :  { %v1206_v31 = vpop.eup %1205 }
 0xc19   :  { %563 = vrot.lane.b32.xlu2 %v1206_v31, %s1414_s18 }
 0xc1a   :  { %v1208_v33 = vpop.eup %1207 }
 0xc1b   :  { %v541_v35 = vadd.f32 1.0, %v1208_v33 }
 0xc1d   :  { %1209 = vrcp.f32 %v541_v35  ;;  %v553_v41 = vand.u32 2147483648, %v541_v35  ;;  %vm547_vm10 = vweird.f32 %v541_v35  ;;  %v551_v42 = vand.u32 2147483647, %v541_v35 }
 0xc1f   :  { %v554_v44 = vor.u32 1.1754944e-38, %v553_v41  ;;  %vm552_vm12 = vcmp.eq.f32.partialorder %v551_v42, 8.507059e+37 }
 0xc23   :  { %v1210_v36 = vpop.eup %1209 }
 0xc24   :  { %v543_v37 = vmul.f32 %v1210_v36, %v541_v35  ;;  %vm548_vm9 = vweird.f32 %v1210_v36 }
 0xc25   :  { %vm549_vm11 = vmor %vm547_vm10, %vm548_vm9  ;;  %vm439_vm9 = vcmask 261126  }
 0xc26   :  { %v544_v38 = vsub.f32 1.0, %v543_v37 }
 0xc28   :  { %v545_v39 = vmul.f32 %v1210_v36, %v544_v38 }
 0xc2a   :  { %v546_v40 = vadd.f32 %v1210_v36, %v545_v39 }
 0xc2c   :  { %v550_v43 = vsel %vm549_vm11, %v1210_v36, %v546_v40 }
 0xc2d   :  { %v555_v10 = vsel %vm552_vm12, %v554_v44, %v550_v43 }
 0xc2e   :  { %v561_v48 = vmul.f32 %v559_v47, %v555_v10 }
 0xc73   :  { %v564_v45 = vpop.permute.xlu2 %563 }
 0xc74   :  { %v566_v46 = vmul.f32 %v564_v45, %v555_v10 }
 0xc76   :  { %568 = vrot.lane.b32.xlu0 %v566_v46, %s1415_s3 }
 0xce8   :  { %v569_v49 = vpop.permute.xlu0 %568 }
 0xce9   :  { %v571_v50 = vadd.f32 %v569_v49, %v561_v48 }
 0xceb   :  { %1211 = vtanh.f32 %v571_v50  ;;  %v633_v16 = vrot.slane %v571_v50, 6 }
 0xcf1   :  { %v1212_v51 = vpop.eup %1211 }
 0xcf2   :  { %574 = vrot.lane.b32.xlu1 %v1212_v51, %s1414_s18 }
 0xd64   :  { %v575_v52 = vpop.permute.xlu1 %574 }
 0xd65   :  { %v1585_v53 = vmul.f32 %v575_v52, %v555_v10 }
 0xd67   :  { %v583_v54 = vrot.slane %v1585_v53, 2 }
 0xd69   :  { %584 = vrot.lane.b32.xlu2 %v583_v54, %s1415_s3  ;;  %v769_v54 = vld [vmem:[#allocation9 + $0x18] sm:$0xff] }
 0xd6a   :  { %788 = vmatpush.msra.mxu3 %v769_v54 }
 0xdc3   :  { %v585_v55 = vpop.permute.xlu2 %584 }
 0xdc4   :  { %1123 = vmatmul.msk.f32.vlgmr.msrb.gmra.mxu0 %vm151_vm6, %v585_v55  ;;  %v768_v55 = vld [vmem:[#allocation9 + $0x10] sm:$0xff] }
 0xdc5   :  { %789 = vmatpush.msra.mxu3 %v768_v55 }
 0xe41   :  { %v605_v57 = vpop.f32.mrf.mxu0 }
 0xe42   :  { %v609_v58 = vrot.slane %v605_v57, 4  ;;  %v767_v57 = vld [vmem:[#allocation9 + $0x8] sm:$0xff] }
 0xe43   :  { %790 = vmatpush.msra.mxu3 %v767_v57  ;;  %v801_v57 = vlaneseq }
 0xe44   :  { %v611_v59 = vadd.f32 %v609_v58, %v1569_v62  ;;  %v766_v58 = vld [vmem:[#allocation9] sm:$0xff] }
 0xe45   :  { %791 = vmatpush.msra.mxu3 %v766_v58  ;;  %v1642_v58 = vand.u32 127, %v801_v57  ;;  %v980_v57 = vrot.slane %v1585_v53, 4 }
 0xe46   :  { %1213 = vtanh.f32 %v611_v59  ;;  %v1124_v63 = vmul.f32 -1.442695, %v611_v59  ;;  %v734_v59 = vld [vmem:[#allocation10 + $0x18] sm:$0xff] }
 0xe47   :  { %756 = vmatpush.msra.mxu2 %v734_v59  ;;  %vm812_vm10 = vcmp.eq.s32.totalorder %v1642_v58, 0  ;;  %vm823_vm11 = vcmp.eq.s32.totalorder %v1642_v58, 1  ;;  %vm849_vm12 = vcmp.eq.s32.totalorder %v1642_v58, 3 }
 0xe48   :  { %1215 = vpow2.f32 %v1124_v63  ;;  %v732_v63 = vld [vmem:[#allocation10 + $0x8] sm:$0xff] }
 0xe4c   :  { %v1214_v60 = vpop.eup %1213 }
 0xe4d   :  { %637 = vrot.lane.b32.xlu0 %v1214_v60, %s1414_s18  ;;  %v733_v60 = vld [vmem:[#allocation10 + $0x10] sm:$0xff] }
 0xe4e   :  { %v1216_v0 = vpop.eup %1215  ;;  %757 = vmatpush.msra.mxu2 %v733_v60 }
 0xe4f   :  { %v615_v1 = vadd.f32 1.0, %v1216_v0  ;;  %v731_v0 = vld [vmem:[#allocation10] sm:$0xff] }
 0xe50   :  { %758 = vmatpush.msra.mxu2 %v732_v63 }
 0xe51   :  { %1217 = vrcp.f32 %v615_v1  ;;  %v627_v9 = vand.u32 2147483648, %v615_v1  ;;  %vm621_vm14 = vweird.f32 %v615_v1  ;;  %v625_v11 = vand.u32 2147483647, %v615_v1 }
 0xe52   :  { %759 = vmatpush.msra.mxu2 %v731_v0 }
 0xe53   :  { %v628_v8 = vor.u32 1.1754944e-38, %v627_v9  ;;  %vm626_vm1 = vcmp.eq.f32.partialorder %v625_v11, 8.507059e+37 }
 0xe57   :  { %v1218_v2 = vpop.eup %1217 }
 0xe58   :  { %v617_v3 = vmul.f32 %v1218_v2, %v615_v1  ;;  %vm622_vm13 = vweird.f32 %v1218_v2 }
 0xe59   :  { %vm623_vm15 = vmor %vm621_vm14, %vm622_vm13  ;;  %vm860_vm13 = vcmp.eq.s32.totalorder %v1642_v58, 4  ;;  %vm871_vm14 = vcmp.eq.s32.totalorder %v1642_v58, 5 }
 0xe5a   :  { %v618_v4 = vsub.f32 1.0, %v617_v3 }
 0xe5c   :  { %v619_v5 = vmul.f32 %v1218_v2, %v618_v4 }
 0xe5e   :  { %v620_v6 = vadd.f32 %v1218_v2, %v619_v5 }
 0xe60   :  { %v624_v12 = vsel %vm623_vm15, %v1218_v2, %v620_v6  ;;  %vm882_vm15 = vcmp.eq.s32.totalorder %v1642_v58, 6 }
 0xe61   :  { %v629_v14 = vsel %vm626_vm1, %v628_v8, %v624_v12  ;;  %v1162_v8 = vld [vmem:[%s1703_s5] ss:$0 sm:$0xff]  ;;  %vm893_vm1 = vcmp.eq.s32.totalorder %v1642_v58, 7 }
 0xe62   :  { %v635_v17 = vmul.f32 %v633_v16, %v629_v14 }
 0xebf   :  { %v638_v13 = vpop.permute.xlu0 %637 }
 0xec0   :  { %v640_v15 = vmul.f32 %v638_v13, %v629_v14 }
 0xec2   :  { %642 = vrot.lane.b32.xlu1 %v640_v15, %s1415_s3 }
 0xf34   :  { %v643_v18 = vpop.permute.xlu1 %642 }
 0xf35   :  { %v645_v19 = vadd.f32 %v643_v18, %v635_v17 }
 0xf37   :  { %1219 = vtanh.f32 %v645_v19  ;;  %v707_v46 = vrot.slane %v645_v19, 6 }
 0xf3d   :  { %v1220_v20 = vpop.eup %1219 }
 0xf3e   :  { %648 = vrot.lane.b32.xlu2 %v1220_v20, %s1414_s18 }
 0xf98   :  { %v649_v21 = vpop.permute.xlu2 %648 }
 0xf99   :  { %v1594_v22 = vmul.f32 %v649_v21, %v629_v14 }
 0xf9b   :  { %v657_v23 = vrot.slane %v1594_v22, 4 }
 0xf9d   :  { %658 = vrot.lane.b32.xlu0 %v657_v23, %s1415_s3 }
0x100f   :  { %v659_v24 = vpop.permute.xlu0 %658 }
0x1010   :  { %1125 = vmatmul.msk.f32.vlgmr.msra.gmra.mxu1 %vm151_vm6, %v659_v24  ;;  %v1163_v24 = vld [vmem:[%s1705_s7] ss:$0 sm:$0xff] }
0x108d   :  { %v679_v26 = vpop.f32.mrf.mxu1 }
0x108e   :  { %v683_v27 = vrot.slane %v679_v26, 2 }
0x1090   :  { %v685_v29 = vadd.f32 %v683_v27, %v1569_v62 }
0x1092   :  { %1221 = vtanh.f32 %v685_v29  ;;  %v1126_v31 = vmul.f32 -1.442695, %v685_v29 }
0x1094   :  { %1223 = vpow2.f32 %v1126_v31 }
0x1098   :  { %v1222_v30 = vpop.eup %1221 }
0x1099   :  { %711 = vrot.lane.b32.xlu1 %v1222_v30, %s1414_s18 }
0x109a   :  { %v1224_v32 = vpop.eup %1223 }
0x109b   :  { %v689_v33 = vadd.f32 1.0, %v1224_v32 }
0x109d   :  { %1225 = vrcp.f32 %v689_v33  ;;  %v701_v40 = vand.u32 2147483648, %v689_v33  ;;  %vm695_vm3 = vweird.f32 %v689_v33  ;;  %v699_v62 = vand.u32 2147483647, %v689_v33 }
0x109f   :  { %v702_v42 = vor.u32 1.1754944e-38, %v701_v40  ;;  %vm700_vm4 = vcmp.eq.f32.partialorder %v699_v62, 8.507059e+37 }
0x10a1   :  { %286 = vrot.lane.b32.xlu1 %v1544_v61, %s1415_s3 }
0x10a3   :  { %v1226_v35 = vpop.eup %1225 }
0x10a4   :  { %v691_v36 = vmul.f32 %v1226_v35, %v689_v33  ;;  %vm696_vm2 = vweird.f32 %v1226_v35 }
0x10a5   :  { %vm697_vm0 = vmor %vm695_vm3, %vm696_vm2  ;;  %vm900_vm2 = vcmask 64518  }
0x10a6   :  { %v692_v37 = vsub.f32 1.0, %v691_v36 }
0x10a8   :  { %v693_v38 = vmul.f32 %v1226_v35, %v692_v37 }
0x10aa   :  { %v694_v39 = vadd.f32 %v1226_v35, %v693_v38 }
0x10ac   :  { %v698_v41 = vsel %vm697_vm0, %v1226_v35, %v694_v39 }
0x10ad   :  { %v703_v44 = vsel %vm700_vm4, %v702_v42, %v698_v41 }
0x10ae   :  { %v709_v47 = vmul.f32 %v707_v46, %v703_v44 }
0x110b   :  { %v712_v43 = vpop.permute.xlu1 %711 }
0x110c   :  { %v714_v45 = vmul.f32 %v712_v43, %v703_v44 }
0x110e   :  { %716 = vrot.lane.b32.xlu2 %v714_v45, %s1415_s3 }
0x1113   :  { %v287_v10 = vpop.permute.xlu1 %286 }
0x1114   :  { %290 = vst.msk [vmem:[#allocation2] sm:$0xc] %vm289_vm7, %v287_v10 }
0x1116   :  { %361 = vrot.lane.b32.xlu2 %v1553_v28, %s1415_s3 }
0x111e   :  { %579 = vrot.lane.b32.xlu2 %v1585_v53, %s1415_s3 }
0x1168   :  { %v717_v48 = vpop.permute.xlu2 %716 }
0x1169   :  { %v719_v49 = vadd.f32 %v717_v48, %v709_v47 }
0x116b   :  { %1227 = vtanh.f32 %v719_v49 }
0x1170   :  { %v362_v50 = vpop.permute.xlu2 %361 }
0x1171   :  { %v1228_v51 = vpop.eup %1227  ;;  %365 = vst.msk [vmem:[#allocation2] sm:$0x30] %vm364_vm8, %v362_v50 }
0x1172   :  { %722 = vrot.lane.b32.xlu0 %v1228_v51, %s1414_s18 }
0x1178   :  { %v580_v52 = vpop.permute.xlu2 %579 }
0x1179   :  { %582 = vst.msk [vmem:[#allocation2 + $0x8] sm:$0xc] %vm289_vm7, %v580_v52 }
0x117a   :  { %436 = vrot.lane.b32.xlu0 %v1562_v56, %s1415_s3 }
0x1182   :  { %653 = vrot.lane.b32.xlu0 %v1594_v22, %s1415_s3 }
0x11e4   :  { %v723_v1 = vpop.permute.xlu0 %722 }
0x11e5   :  { %v1616_v2 = vmul.f32 %v723_v1, %v703_v44 }
0x11e7   :  { %v739_v3 = vrot.slane %v1616_v2, 6 }
0x11e9   :  { %740 = vrot.lane.b32.xlu1 %v739_v3, %s1415_s3 }
0x11ec   :  { %v437_v4 = vpop.permute.xlu0 %436 }
0x11ed   :  { %440 = vst.msk [vmem:[#allocation2] sm:$0xc0] %vm439_vm9, %v437_v4 }
0x11f1   :  { %727 = vrot.lane.b32.xlu1 %v1616_v2, %s1415_s3 }
0x11f4   :  { %v654_v5 = vpop.permute.xlu0 %653  ;;  %v764_v6 = vld [vmem:[#allocation2] sm:$0xff] }
0x11f5   :  { %656 = vst.msk [vmem:[#allocation2 + $0x8] sm:$0x30] %vm364_vm8, %v654_v5  ;;  %1128 = vmatmul.msk.f32.vlgmr.msra.gmra.mxu3 %vm151_vm6, %v764_v6 }
0x125b   :  { %v741_v9 = vpop.permute.xlu1 %740 }
0x125c   :  { %1127 = vmatmul.msk.f32.vlgmr.msra.gmra.mxu2 %vm151_vm6, %v741_v9 }
0x1263   :  { %v728_v11 = vpop.permute.xlu1 %727 }
0x1264   :  { %730 = vst.msk [vmem:[#allocation2 + $0x8] sm:$0xc0] %vm439_vm9, %v728_v11 }
0x126b   :  { %v765_v12 = vld [vmem:[#allocation2 + $0x8] sm:$0xff] }
0x126c   :  { %1129 = vmatmul.msk.f32.gmra.mxu3 %vm151_vm6, %v765_v12 }
0x1278   :  { %v793_v15 = vpop.f32.mrf.mxu3 }
0x12df   :  { %v761_v13 = vpop.f32.mrf.mxu2 }
0x12e0   :  { %v762_v14 = vadd.f32 %v1162_v8, %v761_v13 }
0x12e2   :  { %v803_v16 = vadd.f32 %v793_v15, %v762_v14  ;;  %v815_v17 = vrot.slane %v762_v14, 6  ;;  %v828_v18 = vrot.slane %v762_v14, 4  ;;  %v841_v19 = vrot.slane %v762_v14, 2 }
0x12e4   :  { %1229 = vtanh.f32 %v803_v16  ;;  %v817_v20 = vadd.f32 %v815_v17, %v793_v15  ;;  %v830_v21 = vadd.f32 %v828_v18, %v793_v15  ;;  %v843_v23 = vadd.f32 %v841_v19, %v793_v15 }
0x12e6   :  { %1231 = vtanh.f32 %v817_v20 }
0x12e7   :  { %1233 = vtanh.f32 %v830_v21 }
0x12e8   :  { %1235 = vtanh.f32 %v843_v23  ;;  %v898_v23 = vstv %s1708_s10 }
0x12ea   :  { %v1230_v26 = vpop.eup %1229 }
0x12eb   :  { %v808_v27 = vmul.f32 %v1230_v26, %v1163_v24 }
0x12ec   :  { %v1232_v29 = vpop.eup %1231 }
0x12ed   :  { %v1234_v30 = vpop.eup %1233  ;;  %v809_v31 = vsel %vm217_vm5, %v808_v27, 0.0  ;;  %v819_v32 = vmul.f32 %v1232_v29, %v1163_v24 }
0x12ee   :  { %v1236_v33 = vpop.eup %1235  ;;  %810 = vadd.xlane.f32.xlu2 %v809_v31  ;;  %v832_v35 = vmul.f32 %v1234_v30, %v1163_v24 }
0x12ef   :  { %v796_v36 = vpop.f32.mrf.mxu3  ;;  %v820_v37 = vsel %vm289_vm7, %v819_v32, 0.0  ;;  %v845_v41 = vmul.f32 %v1236_v33, %v1163_v24 }
0x12f0   :  { %v854_v38 = vadd.f32 %v796_v36, %v762_v14  ;;  %v865_v39 = vadd.f32 %v815_v17, %v796_v36  ;;  %v876_v40 = vadd.f32 %v828_v18, %v796_v36  ;;  %821 = vadd.xlane.f32.xlu0 %v820_v37  ;;  %v833_v62 = vsel %vm364_vm8, %v832_v35, 0.0 }
0x12f1   :  { %834 = vadd.xlane.f32.xlu1 %v833_v62  ;;  %v887_v42 = vadd.f32 %v841_v19, %v796_v36  ;;  %v846_v43 = vsel %vm439_vm9, %v845_v41, 0.0  ;;  %v1416_v35 = vmov 7   ;;  %v1417_v36 = vmov 3  }
0x12f2   :  { %1237 = vtanh.f32 %v854_v38  ;;  %1152 = vset.pattern.permute.xlu0 %v1416_v35  ;;  %1151 = vset.pattern.permute.xlu2 %v1417_v36  ;;  %v1418_v37 = vmov 0  }
0x12f3   :  { %1239 = vtanh.f32 %v865_v39  ;;  %1153 = vset.pattern.permute.xlu1 %v1418_v37 }
0x12f4   :  { %1241 = vtanh.f32 %v876_v40 }
0x12f5   :  { %1243 = vtanh.f32 %v887_v42 }
0x12f6   :  { %847 = vadd.xlane.f32.xlu2 %v846_v43 }
0x12f8   :  { %v1238_v44 = vpop.eup %1237 }
0x12f9   :  { %v1240_v45 = vpop.eup %1239  ;;  %v856_v10 = vmul.f32 %v1238_v44, %v1163_v24 }
0x12fa   :  { %v1242_v46 = vpop.eup %1241  ;;  %v867_v47 = vmul.f32 %v1240_v45, %v1163_v24 }
0x12fb   :  { %v878_v48 = vmul.f32 %v1242_v46, %v1163_v24  ;;  %v857_v51 = vsel %vm217_vm5, %v856_v10, 0.0  ;;  %v1244_v52 = vpop.eup %1243  ;;  %vm836_vm5 = vcmp.eq.s32.totalorder %v1642_v58, 2 }
0x12fc   :  { %v868_v49 = vsel %vm289_vm7, %v867_v47, 0.0  ;;  %v889_v54 = vmul.f32 %v1244_v52, %v1163_v24  ;;  %v1421_v52 = vmov 2  }
0x12fd   :  { %v879_v50 = vsel %vm364_vm8, %v878_v48, 0.0  ;;  %869 = vadd.xlane.f32.xlu0 %v868_v49  ;;  %v930_v48 = vrot.slane %v1534_v34, 2  ;;  %v1419_v49 = vmov 1   ;;  %v970_v34 = vrot.slane %v1575_v25, 2 }
0x12fe   :  { %880 = vadd.xlane.f32.xlu1 %v879_v50  ;;  %858 = vadd.xlane.f32.xlu2 %v857_v51  ;;  %v890_v55 = vsel %vm439_vm9, %v889_v54, 0.0  ;;  %v1420_v50 = vmov 6   ;;  %v940_v51 = vrot.slane %v1544_v61, 4  ;;  %v950_v54 = vrot.slane %v1553_v28, 6 }
0x12ff   :  { %v990_v61 = vrot.slane %v1594_v22, 6  ;;  %v1423_v28 = vmov 5   ;;  %vm1038_vm9 = vcmask 33792  }
0x1306   :  { %891 = vadd.xlane.f32.xlu2 %v890_v55  ;;  %v1422_v55 = vmov 4  }
0x1361   :  { %v811_v59 = vpop.xlane.xlu2 %810 }
0x1362   :  { %v813_v60 = vsel %vm812_vm10, %v811_v59, 0.0  ;;  %vm1073_vm10 = vcmask 0  }
0x1363   :  { %v825_v63 = vrot.slane %v813_v60, 6  ;;  %v822_v0 = vpop.xlane.xlu0 %821 }
0x1364   :  { %v835_v4 = vpop.xlane.xlu1 %834 }
0x1365   :  { %v827_v1 = vsel %vm823_vm11, %v822_v0, %v825_v63 }
0x1366   :  { %v838_v3 = vrot.slane %v827_v1, 6 }
0x1368   :  { %v840_v5 = vsel %vm836_vm5, %v835_v4, %v838_v3  ;;  %v1009_v4 = vld [vmem:[%s1706_s8 + $0x18] sm:$0xff] }
0x1369   :  { %v851_v6 = vrot.slane %v840_v5, 6  ;;  %v848_v9 = vpop.xlane.xlu2 %847  ;;  %1030 = vmatpush.msra.mxu0 %v1009_v4  ;;  %v1006_v5 = vld [vmem:[%s1706_s8] sm:$0xff] }
0x136b   :  { %v853_v11 = vsel %vm849_vm12, %v848_v9, %v851_v6  ;;  %v1052_v9 = vld [vmem:[%s1709_s11] sm:$0x3] }
0x136c   :  { %v862_v12 = vrot.slane %v853_v11, 6 }
0x1370   :  { %v870_v15 = vpop.xlane.xlu0 %869 }
0x1371   :  { %v859_v8 = vpop.xlane.xlu2 %858  ;;  %v881_v18 = vpop.xlane.xlu1 %880 }
0x1372   :  { %v864_v13 = vsel %vm860_vm13, %v859_v8, %v862_v12 }
0x1373   :  { %v873_v14 = vrot.slane %v864_v13, 6 }
0x1375   :  { %v875_v16 = vsel %vm871_vm14, %v870_v15, %v873_v14 }
0x1376   :  { %v884_v17 = vrot.slane %v875_v16, 6 }
0x1378   :  { %v886_v19 = vsel %vm882_vm15, %v881_v18, %v884_v17 }
0x1379   :  { %v895_v20 = vrot.slane %v886_v19, 6  ;;  %v892_v21 = vpop.xlane.xlu2 %891 }
0x137b   :  { %v897_v24 = vsel %vm893_vm1, %v892_v21, %v895_v20 }
0x137c   :  { %v899_v26 = vadd.f32 %v898_v23, %v897_v24 }
0x137e   :  { %v901_v27 = vsel %vm900_vm2, %v899_v26, -inf }
0x137f   :  { %902 = vmax.xlane.f32.xlu0 %v901_v27 }
0x13f2   :  { %v903_v29 = vpop.xlane.xlu0 %902 }
0x13f3   :  { %v904_v30 = vsub.f32 %v899_v26, %v903_v29 }
0x13f5   :  { %v905_v31 = vmul.f32 1.442695, %v904_v30 }
0x13f7   :  { %1245 = vpow2.f32 %v905_v31 }
0x13fd   :  { %v1246_v32 = vpop.eup %1245 }
0x13fe   :  { %v907_v33 = vsel %vm900_vm2, %v1246_v32, 0.0 }
0x13ff   :  { %908 = vadd.xlane.f32.xlu1 %v907_v33 }
0x1472   :  { %v909_v38 = vpop.xlane.xlu1 %908 }
0x1473   :  { %1247 = vrcp.f32 %v909_v38  ;;  %v921_v41 = vand.u32 2147483648, %v909_v38  ;;  %v919_v43 = vand.u32 2147483647, %v909_v38  ;;  %vm915_vm0 = vweird.f32 %v909_v38 }
0x1475   :  { %v922_v45 = vor.u32 1.1754944e-38, %v921_v41  ;;  %vm920_vm7 = vcmp.eq.f32.partialorder %v919_v43, 8.507059e+37 }
0x1479   :  { %v1248_v39 = vpop.eup %1247 }
0x147a   :  { %v911_v40 = vmul.f32 %v1248_v39, %v909_v38  ;;  %vm916_vm3 = vweird.f32 %v1248_v39 }
0x147b   :  { %vm917_vm4 = vmor %vm915_vm0, %vm916_vm3 }
0x147c   :  { %v912_v62 = vsub.f32 1.0, %v911_v40 }
0x147e   :  { %v913_v42 = vmul.f32 %v1248_v39, %v912_v62 }
0x1480   :  { %v914_v44 = vadd.f32 %v1248_v39, %v913_v42 }
0x1482   :  { %v918_v10 = vsel %vm917_vm4, %v1248_v39, %v914_v44 }
0x1483   :  { %v923_v46 = vsel %vm920_vm7, %v922_v45, %v918_v10 }
0x1484   :  { %v924_v47 = vmul.f32 %v1246_v32, %v923_v46 }
0x1486   :  { %927 = vperm.xlu1 %1153, %v924_v47   ;;  %997 = vperm.xlu0 %1152, %v924_v47  }
0x1487   :  { %957 = vperm.xlu2 %1151, %v924_v47  }
0x148e   :  { %1154 = vset.pattern.permute.xlu1 %v1419_v49  ;;  %1157 = vset.pattern.permute.xlu0 %v1423_v28 }
0x148f   :  { %931 = vrot.lane.b32.xlu2 %v930_v48, %s1415_s3  ;;  %937 = vperm.xlu1 %1154, %v924_v47  }
0x1490   :  { %1158 = vset.pattern.permute.xlu2 %v1420_v50 }
0x1497   :  { %941 = vrot.lane.b32.xlu2 %v940_v51, %s1415_s3  ;;  %1155 = vset.pattern.permute.xlu1 %v1421_v52 }
0x1498   :  { %947 = vperm.xlu1 %1155, %v924_v47  }
0x149f   :  { %951 = vrot.lane.b32.xlu2 %v950_v54, %s1415_s3 }
0x14a0   :  { %1156 = vset.pattern.permute.xlu1 %v1422_v55 }
0x14a1   :  { %967 = vperm.xlu1 %1156, %v924_v47  }
0x14a7   :  { %971 = vrot.lane.b32.xlu2 %v970_v34, %s1415_s3 }
0x14a9   :  { %981 = vrot.lane.b32.xlu1 %v980_v57, %s1415_s3 }
0x14aa   :  { %1159 = vset.pattern.permute.xlu1 %v1418_v37 }
0x14af   :  { %987 = vperm.xlu2 %1158, %v924_v47  }
0x14b1   :  { %991 = vrot.lane.b32.xlu1 %v990_v61, %s1415_s3 }
0x14b9   :  { %1054 = vperm.xlu1 %1159, %v1052_v9  }
0x14e1   :  { %v958_v59 = vpop.permute.xlu2 %957 }
0x14e2   :  { %v960_v60 = vmul.f32 %v958_v59, %v1562_v56  ;;  %v1008_v56 = vld [vmem:[%s1706_s8 + $0x10] sm:$0xff] }
0x14e3   :  { %1031 = vmatpush.msra.mxu0 %v1008_v56 }
0x14e4   :  { %962 = vrot.lane.b32.xlu0 %v960_v60, %s1415_s3 }
0x14e9   :  { %v932_v0 = vpop.permute.xlu2 %931 }
0x14ec   :  { %977 = vperm.xlu0 %1157, %v924_v47  }
0x14f1   :  { %v942_v22 = vpop.permute.xlu2 %941 }
0x14f4   :  { %1160 = vset.pattern.permute.xlu0 %v1418_v37  ;;  %v1164_v37 = vld [vmem:[%s1707_s9] ss:$0 sm:$0xff] }
0x14f8   :  { %v998_v25 = vpop.permute.xlu0 %997  ;;  %v928_v63 = vpop.permute.xlu1 %927 }
0x14f9   :  { %v1000_v53 = vmul.f32 %v998_v25, %v1616_v2  ;;  %v1007_v2 = vld [vmem:[%s1706_s8 + $0x8] sm:$0xff]  ;;  %v952_v6 = vpop.permute.xlu2 %951  ;;  %v934_v14 = vmul.f32 %v932_v0, %v928_v63 }
0x14fa   :  { %1032 = vmatpush.msra.mxu0 %v1007_v2 }
0x14fb   :  { %1002 = vrot.lane.b32.xlu2 %v1000_v53, %s1415_s3 }
0x14fc   :  { %1033 = vmatpush.msra.mxu0 %v1006_v5 }
0x1501   :  { %v938_v1 = vpop.permute.xlu1 %937  ;;  %v972_v12 = vpop.permute.xlu2 %971 }
0x1502   :  { %v944_v8 = vmul.f32 %v942_v22, %v938_v1 }
0x1504   :  { %v945_v17 = vadd.f32 %v944_v8, %v934_v14 }
0x1509   :  { %v988_v20 = vpop.permute.xlu2 %987 }
0x150a   :  { %v948_v3 = vpop.permute.xlu1 %947 }
0x150b   :  { %v954_v15 = vmul.f32 %v952_v6, %v948_v3 }
0x150d   :  { %v955_v18 = vadd.f32 %v954_v15, %v945_v17 }
0x1513   :  { %v968_v11 = vpop.permute.xlu1 %967 }
0x1514   :  { %v974_v21 = vmul.f32 %v972_v12, %v968_v11 }
0x151b   :  { %v982_v13 = vpop.permute.xlu1 %981 }
0x1523   :  { %v992_v23 = vpop.permute.xlu1 %991 }
0x1524   :  { %v994_v29 = vmul.f32 %v992_v23, %v988_v20 }
0x152b   :  { %v1055_v36 = vpop.permute.xlu1 %1054 }
0x152c   :  { %vm1056_vm8 = vcmp.eq.s32.totalorder %v1642_v58, %v1055_v36 }
0x152d   :  { %v1131_v38 = vsel %vm1056_vm8, 1.0, %v1413_v7 }
0x1555   :  { %v1003_v32 = vpop.permute.xlu2 %1002 }
0x1556   :  { %v963_v16 = vpop.permute.xlu0 %962 }
0x1557   :  { %v965_v19 = vadd.f32 %v963_v16, %v955_v18 }
0x1559   :  { %v975_v26 = vadd.f32 %v974_v21, %v965_v19 }
0x155e   :  { %v978_v24 = vpop.permute.xlu0 %977 }
0x155f   :  { %v984_v27 = vmul.f32 %v982_v13, %v978_v24 }
0x1561   :  { %v985_v30 = vadd.f32 %v984_v27, %v975_v26 }
0x1563   :  { %v995_v31 = vadd.f32 %v994_v29, %v985_v30 }
0x1565   :  { %v1005_v33 = vadd.f32 %v1003_v32, %v995_v31 }
0x1567   :  { %v1015_v35 = vrot.slane %v1005_v33, 6 }
0x1569   :  { %1130 = vmatmul.msk.f32.vlgmr.msra.gmra.mxu0 %vm151_vm6, %v1015_v35  ;;  %vm1064_vm6 = vcmask 1041408  }
0x15e6   :  { %v1035_v39 = vpop.f32.mrf.mxu0 }
0x15e7   :  { %v1036_v40 = vadd.f32 %v1164_v37, %v1035_v39 }
0x15e9   :  { %v1040_v62 = vsel %vm1038_vm9, %v1036_v40, -inf  ;;  %1039 = vst.msk [vmem:[#allocation12] sm:$0x3] %vm1038_vm9, %v1036_v40  ;;  %v1059_v41 = vmul.f32 %v1131_v38, %v1036_v40 }
0x15ea   :  { %1041 = vmax.xlane.f32.xlu0 %v1040_v62  ;;  %1085 = dma.vmem_to_hbm [thread:$0]  %s1081_s14, 32, %s1083_s29, [#allocation6]  }
0x15eb   :  { %v1060_v42 = vsel %vm1038_vm9, %v1059_v41, 0.0 }
0x15ec   :  { %1061 = vadd.xlane.f32.xlu1 %v1060_v42 }
0x165d   :  { %v1042_v43 = vpop.xlane.xlu0 %1041 }
0x165e   :  { %v1043_v44 = vsub.f32 %v1036_v40, %v1042_v43 }
0x165f   :  { %v1062_v49 = vpop.xlane.xlu1 %1061 }
0x1660   :  { %v1044_v45 = vmul.f32 1.442695, %v1043_v44 }
0x1662   :  { %1249 = vpow2.f32 %v1044_v45 }
0x1668   :  { %v1250_v58 = vpop.eup %1249 }
0x1669   :  { %v1046_v10 = vsel %vm1038_vm9, %v1250_v58, 0.0 }
0x166a   :  { %1047 = vadd.xlane.f32.xlu2 %v1046_v10 }
0x16dd   :  { %v1048_v7 = vpop.xlane.xlu2 %1047 }
0x16de   :  { %1251 = vlog2.f32 %v1048_v7 }
0x16e4   :  { %v1252_v46 = vpop.eup %1251 }
0x16e5   :  { %v1050_v47 = vmul.f32 0.6931472, %v1252_v46 }
0x16e7   :  { %v1051_v48 = vadd.f32 %v1050_v47, %v1042_v43 }
0x16e9   :  { %v1063_v50 = vsub.f32 %v1051_v48, %v1062_v49 }
0x16eb   :  { %v1065_v51 = vsel %vm1064_vm6, %v1063_v50, 0.0 }
0x16ec   :  { %v1066_v52 = vrot.slane %v1065_v51, 4 }
0x16ee   :  { %v1067_v54 = vadd.f32 %v1066_v52, %v1065_v51 }
0x16f0   :  { %v1068_v55 = vrot.slane %v1067_v54, 2 }
0x16f2   :  { %v1069_v34 = vadd.f32 %v1068_v55, %v1067_v54 }
0x16f4   :  { %v1070_v57 = vrot.slane %v1069_v34, 1 }
0x16f6   :  { %v1071_v61 = vadd.f32 %v1070_v57, %v1069_v34 }
0x16f8   :  { %v1072_v28 = vmul.f32 0.5, %v1071_v61 }
0x16fa   :  { %1074 = vst.msk [vmem:[#allocation13] sm:$0x1] %vm1073_vm10, %v1072_v28 }
0x16fb   :  { %1096 = dma.vmem_to_hbm [thread:$0]  %s1092_s15, 16, %s1094_s17, [#allocation14]  }
0x16fc   :  { %1403 = dma.done.wait [#allocation6], 32  }
0x16fd   :  { %1404 = vsyncadd [#allocation6], 4294967264 }
0x16fe   :  { %1405 = dma.done.wait [#allocation14], 16  }
0x16ff   :  { %1406 = vsyncadd [#allocation14], 4294967280 }
0x1700   :  { %1105 = vsyncpa [#allocation5], 1 }
0x1701   :  { %1106 = vsyncpa [#allocation8], 1 }
0x1702   :  { %1107 = vsyncpa [#allocation11], 1 }
0x1703   :  { %1108 = vsyncpa [#allocation6], 1 }
0x1704   :  { %1109 = vsyncpa [#allocation14], 1 }

</bundles_post_ra>
